<compile_context>
chip_gen: v5e
topology: v5e:2x2
jax: 0.10.0
libtpu: 0.0.40
codegen_flags: <defaults>
</compile_context>

<pallas_src>
import numpy as np
import jax
import jax.numpy as jnp
from jax.experimental import pallas as pl
from jax.experimental.pallas import tpu as pltpu


# ----------------------------------------------------------------------------
# Setup-time helpers (plain numpy "glue", mirrors the PyTorch __init__ code)
# ----------------------------------------------------------------------------
def _solve_tridiagonal_np(a, b, c, d):
    n = len(d)
    cp = np.zeros_like(d)
    dp = np.zeros_like(d)
    cp[0] = c[0] / b[0]
    dp[0] = d[0] / b[0]
    for i in range(1, n):
        denom = b[i] - a[i] * cp[i - 1]
        cp[i] = c[i] / denom if i < n - 1 else 0.0
        dp[i] = (d[i] - a[i] * dp[i - 1]) / denom
    x = np.zeros_like(d)
    x[-1] = dp[-1]
    for i in reversed(range(n - 1)):
        x[i] = dp[i] - cp[i] * x[i + 1]
    return x


def compute_second_derivatives_np(x_points, y_points):
    x = np.asarray(x_points, np.float64)
    y = np.asarray(y_points, np.float64)
    n = len(x)
    intervals = x[1:] - x[:-1]
    dy = (y[1:] - y[:-1]) / intervals
    a = np.zeros(n)
    b = np.zeros(n)
    c = np.zeros(n)
    d = np.zeros(n)
    b[0] = 1.0
    b[-1] = 1.0
    for i in range(1, n - 1):
        a[i] = intervals[i - 1] / 6.0
        b[i] = (intervals[i - 1] + intervals[i]) / 3.0
        c[i] = intervals[i] / 6.0
        d[i] = dy[i] - dy[i - 1]
    return _solve_tridiagonal_np(a, b, c, d)


def _local_interval_coeffs(xp, yp, d2):
    """Local cubic coefficients about the LEFT knot of each interval.

    On interval i (u = t - x_left[i]):  S = a0 + a1*u + a2*u^2 + a3*u^3.
    Mathematically identical to the classic two-sided spline formula, but
    much better conditioned in float32 than absolute-coordinate monomials.
    """
    xp = np.asarray(xp, np.float64)
    yp = np.asarray(yp, np.float64)
    d2 = np.asarray(d2, np.float64)
    xl, xr = xp[:-1], xp[1:]
    yl, yr = yp[:-1], yp[1:]
    dl, dr = d2[:-1], d2[1:]
    h = xr - xl
    a0 = yl
    a1 = (yr - yl) / h - h * (2.0 * dl + dr) / 6.0
    a2 = dl / 2.0
    a3 = (dr - dl) / (6.0 * h)
    return np.stack([a0, a1, a2, a3], axis=0)  # (4, n_intervals)


def build_reciprocal_spline_tables(x_points, y_points, y_at_zero=None):
    """Mirrors CubicSplineReciprocal.__init__ and builds the packed kernel table."""
    x_points = np.asarray(x_points, np.float64)
    y_points = np.asarray(y_points, np.float64)
    if y_at_zero is None:
        y_at_zero = y_points[0]

    # reversed (1/x) spline
    rx = np.concatenate([np.zeros(1), 1.0 / x_points[::-1]])
    ry = np.concatenate([np.zeros(1), y_points[::-1]])
    rd2 = compute_second_derivatives_np(rx, ry)

    # small "zero" spline used below x_points[0]
    zx = np.array([0.0, x_points[0], x_points[1]])
    zy = np.array([float(y_at_zero), y_points[0], y_points[1]])
    zd2 = compute_second_derivatives_np(zx, zy)

    rc = _local_interval_coeffs(rx, ry, rd2)   # (4, n_int)
    zc = _local_interval_coeffs(zx, zy, zd2)   # (4, 2)
    n_int = rc.shape[1]

    thr = rx[1:-1]           # interior knots (monotone thresholds), n_int-1
    xl = rx[:-1]             # left knot of each interval, n_int

    def delta(v):            # threshold-delta encoding: v[0], then diffs
        d = np.asarray(v, np.float64).copy()
        d[1:] = v[1:] - v[:-1]
        return d

    packed = np.concatenate([
        np.array([x_points[0]]),   # [0]    zero-branch threshold
        zc[:, 0],                  # [1:5]  zero-spline interval-0 coeffs (left knot = 0)
        thr,                       # interior-knot thresholds
        delta(xl),                 # left-knot deltas
        delta(rc[0]), delta(rc[1]), delta(rc[2]), delta(rc[3]),
    ])
    table = jnp.asarray(packed, jnp.float32)
    raw = (zx, zy, zd2, rx, ry, rd2)           # float64, for the numpy reference
    return table, n_int, raw


# ----------------------------------------------------------------------------
# Pallas kernel
# ----------------------------------------------------------------------------
def _make_kernel(n_int: int):
    """n_int = number of intervals of the reversed (1/x) spline."""
    THR0 = 5                     # interior-knot thresholds
    DXL0 = THR0 + (n_int - 1)    # left-knot deltas
    DA00 = DXL0 + n_int
    DA10 = DA00 + n_int
    DA20 = DA10 + n_int
    DA30 = DA20 + n_int

    def kernel(tab_ref, x_ref, o_ref):
        x = x_ref[...]                       # (block_rows, W) f32 tile
        x0 = tab_ref[0]                      # == original x_points[0]
        use_zero = x < x0

        # ---- zero spline: only its first interval is ever selected; its left
        # knot is 0, so the local polynomial is a Horner polynomial in x ------
        zero_val = ((tab_ref[4] * x + tab_ref[3]) * x + tab_ref[2]) * x + tab_ref[1]

        # ---- reversed spline evaluated at t = 1/safe_x -----------------------
        safe_x = jnp.where(use_zero, x0, x)
        # EUP approx reciprocal (idle slot) + one Newton-Raphson refinement.
        r = pl.reciprocal(safe_x, approx=True)
        t = r * (2.0 - safe_x * r)

        # monotone-threshold accumulation of the local coefficients and the
        # left knot: selected interval i = #(interior knots <= t), matching
        # clip(searchsorted(rx, t, right=True) - 1, 0, n_int-1).
        shp = x.shape
        xl = jnp.full(shp, tab_ref[DXL0], jnp.float32)
        a0 = jnp.full(shp, tab_ref[DA00], jnp.float32)
        a1 = jnp.full(shp, tab_ref[DA10], jnp.float32)
        a2 = jnp.full(shp, tab_ref[DA20], jnp.float32)
        a3 = jnp.full(shp, tab_ref[DA30], jnp.float32)
        for k in range(1, n_int):
            m = (t >= tab_ref[THR0 + k - 1]).astype(jnp.float32)
            xl = xl + m * tab_ref[DXL0 + k]
            a0 = a0 + m * tab_ref[DA00 + k]
            a1 = a1 + m * tab_ref[DA10 + k]
            a2 = a2 + m * tab_ref[DA20 + k]
            a3 = a3 + m * tab_ref[DA30 + k]

        u = t - xl
        rev_val = ((a3 * u + a2) * u + a1) * u + a0

        o_ref[...] = jnp.where(use_zero, zero_val, rev_val)

    return kernel


_BLOCK_ELEMS = 512 * 1024        # 2 MiB of f32 per block (in+out buffered ~8 MiB)


def _choose_blocking(rows: int, W: int):
    if rows <= 8:
        return rows, 1                               # single full-dim block
    cap = max(8, ((_BLOCK_ELEMS // W) // 8) * 8)     # rows per ~2 MiB block
    nb = -(-rows // cap)
    # Encourage enough (and an even number of) grid steps so a 2-TensorCore
    # chip (v7x) gets balanced work on the PARALLEL axis.
    nb = max(nb, 8 if rows >= 64 else 2)
    if nb % 2:
        nb += 1
    block_rows = -(-rows // nb)
    block_rows = ((block_rows + 7) // 8) * 8         # (8,128) block alignment
    nb = -(-rows // block_rows)                      # edge blocks are clipped
    return block_rows, nb


def cubic_spline_reciprocal(x, table, n_int):
    """Evaluate the reciprocal cubic spline at `x` (any shape, float32)."""
    orig_shape = x.shape
    flat = jnp.asarray(x, jnp.float32).reshape(-1)
    n = int(flat.shape[0])

    # Widest lane count in {1024,512,256,128} dividing n -> free 2-D view,
    # no pad and no output slice (no extra HBM passes outside the kernel).
    W = next((w for w in (1024, 512, 256, 128) if n % w == 0), None)
    ragged = W is None
    if ragged:
        # TODO(synk): a fully copy-free ragged-element path needs a manual-DMA
        # tail block; the pad+slice fallback is only taken when n % 128 != 0.
        W = 512
        flat = jnp.pad(flat, (0, (-n) % W), constant_values=1.0)
    rows = int(flat.shape[0]) // W
    x2d = flat.reshape(rows, W)

    block_rows, nb = _choose_blocking(rows, W)
    n_elems = rows * W

    out2d = pl.pallas_call(
        _make_kernel(n_int),
        out_shape=jax.ShapeDtypeStruct((rows, W), jnp.float32),
        grid=(nb,),
        in_specs=[
            pl.BlockSpec(memory_space=pltpu.MemorySpace.SMEM),   # packed tables
            pl.BlockSpec((block_rows, W), lambda i: (i, 0)),
        ],
        out_specs=pl.BlockSpec((block_rows, W), lambda i: (i, 0)),
        compiler_params=pltpu.CompilerParams(
            # TODO(synk): if a v7x profile shows only one busy TensorCore,
            # switch this axis to pltpu.CORE_PARALLEL.
            dimension_semantics=(pltpu.PARALLEL,),
            vmem_limit_bytes=32 * 1024 * 1024,
        ),
        cost_estimate=pl.CostEstimate(
            flops=(12 * n_int + 40) * n_elems,
            transcendentals=n_elems,
            bytes_accessed=8 * n_elems,
        ),
    )(table, x2d)

    out = out2d.reshape(-1)
    if ragged:
        out = out[:n]
    return out.reshape(orig_shape)


# ----------------------------------------------------------------------------
# Pure-numpy reference (matches the PyTorch forward, float64)
# ----------------------------------------------------------------------------
def _spline_eval_np(xp, yp, d2, x):
    i = np.searchsorted(xp, x, side="right") - 1
    i = np.clip(i, 0, len(xp) - 2)
    h = xp[i + 1] - xp[i]
    a = (xp[i + 1] - x) / h
    b = (x - xp[i]) / h
    h26 = h * h / 6.0
    return (a * (yp[i] + (a * a - 1.0) * d2[i] * h26)
            + b * (yp[i + 1] + (b * b - 1.0) * d2[i + 1] * h26))


def ref_forward_np(x, raw):
    zx, zy, zd2, rx, ry, rd2 = raw
    x = np.asarray(x, np.float64)
    x0 = zx[1]
    safe = np.where(x < x0, x0, x)
    return np.where(x < x0,
                    _spline_eval_np(zx, zy, zd2, x),
                    _spline_eval_np(rx, ry, rd2, 1.0 / safe))


# ----------------------------------------------------------------------------
if __name__ == "__main__":
    # deterministic spline definition (synthetic "parameters")
    n_knots = 16
    x_points = np.linspace(0.5, 8.0, n_knots).astype(np.float64)
    y_points = np.exp(-0.5 * x_points) / x_points
    table, n_int, raw = build_reciprocal_spline_tables(x_points, y_points)

    # deterministic evaluation points spanning below x_points[0] and above
    # x_points[-1]; shapes exercise the aligned, edge-block and ragged paths.
    key = jax.random.PRNGKey(0)
    k1, k2, k3 = jax.random.split(key, 3)
    test_inputs = [
        jax.random.uniform(k1, (16, 128), jnp.float32, 0.05, 10.0),     # aligned
        jax.random.uniform(k2, (3, 300, 5), jnp.float32, 0.05, 10.0),   # ragged + edge block
        jax.random.uniform(k3, (7, 33), jnp.float32, 0.05, 10.0),       # tiny ragged
    ]

    for xt in test_inputs:
        out = jax.block_until_ready(cubic_spline_reciprocal(xt, table, n_int))
        ref = ref_forward_np(np.asarray(xt), raw)
        np.testing.assert_allclose(np.asarray(out), ref, rtol=2e-4, atol=1e-5)

    print("KERNEL_OK")
</pallas_src>

<mosaic_0001>
module attributes {stable_mosaic.version = 11 : i64} {
  func.func @kernel(%arg0: i32, %arg1: memref<100xf32, #tpu.memory_space<smem>>, %arg2: memref<2x1024xf32, #tpu.memory_space<vmem>>, %arg3: memref<2x1024xf32, #tpu.memory_space<vmem>>) attributes {dimension_semantics = [#tpu.dimension_semantics<parallel>], iteration_bounds = array<i64: 1>, scalar_prefetch = 0 : i64, scratch_operands = 0 : i64, tpu.core_type = #tpu.core_type<tc>, window_params = [{transform_indices = @transform_0, window_bounds = array<i64: 100>}, {transform_indices = @transform_1, window_bounds = array<i64: 2, 1024>}, {transform_indices = @transform_2, window_bounds = array<i64: 2, 1024>}]} {
    %c0 = arith.constant 0 : index
    %c0_0 = arith.constant 0 : index
    %0 = vector.load %arg2[%c0, %c0_0] : memref<2x1024xf32, #tpu.memory_space<vmem>>, vector<2x1024xf32>
    %c0_1 = arith.constant 0 : index
    %1 = memref.load %arg1[%c0_1] : memref<100xf32, #tpu.memory_space<smem>>
    %2 = vector.broadcast %1 : f32 to vector<2x1024xf32>
    %3 = arith.cmpf olt, %0, %2 : vector<2x1024xf32>
    %c4 = arith.constant 4 : index
    %4 = memref.load %arg1[%c4] : memref<100xf32, #tpu.memory_space<smem>>
    %5 = vector.broadcast %4 : f32 to vector<2x1024xf32>
    %6 = arith.mulf %5, %0 : vector<2x1024xf32>
    %c3 = arith.constant 3 : index
    %7 = memref.load %arg1[%c3] : memref<100xf32, #tpu.memory_space<smem>>
    %8 = vector.broadcast %7 : f32 to vector<2x1024xf32>
    %9 = arith.addf %6, %8 : vector<2x1024xf32>
    %10 = arith.mulf %9, %0 : vector<2x1024xf32>
    %c2 = arith.constant 2 : index
    %11 = memref.load %arg1[%c2] : memref<100xf32, #tpu.memory_space<smem>>
    %12 = vector.broadcast %11 : f32 to vector<2x1024xf32>
    %13 = arith.addf %10, %12 : vector<2x1024xf32>
    %14 = arith.mulf %13, %0 : vector<2x1024xf32>
    %c1 = arith.constant 1 : index
    %15 = memref.load %arg1[%c1] : memref<100xf32, #tpu.memory_space<smem>>
    %16 = vector.broadcast %15 : f32 to vector<2x1024xf32>
    %17 = arith.addf %14, %16 : vector<2x1024xf32>
    %18 = vector.broadcast %1 : f32 to vector<2x1024xf32>
    %19 = arith.select %3, %18, %0 : vector<2x1024xi1>, vector<2x1024xf32>
    %20 = tpu.reciprocal %19 {approx = true} : vector<2x1024xf32> -> vector<2x1024xf32>
    %21 = arith.mulf %19, %20 : vector<2x1024xf32>
    %cst = arith.constant 2.000000e+00 : f32
    %22 = vector.broadcast %cst : f32 to vector<2x1024xf32>
    %23 = arith.subf %22, %21 : vector<2x1024xf32>
    %24 = arith.mulf %20, %23 : vector<2x1024xf32>
    %c20 = arith.constant 20 : index
    %25 = memref.load %arg1[%c20] : memref<100xf32, #tpu.memory_space<smem>>
    %26 = vector.broadcast %25 : f32 to vector<2x1024xf32>
    %c36 = arith.constant 36 : index
    %27 = memref.load %arg1[%c36] : memref<100xf32, #tpu.memory_space<smem>>
    %28 = vector.broadcast %27 : f32 to vector<2x1024xf32>
    %c52 = arith.constant 52 : index
    %29 = memref.load %arg1[%c52] : memref<100xf32, #tpu.memory_space<smem>>
    %30 = vector.broadcast %29 : f32 to vector<2x1024xf32>
    %c68 = arith.constant 68 : index
    %31 = memref.load %arg1[%c68] : memref<100xf32, #tpu.memory_space<smem>>
    %32 = vector.broadcast %31 : f32 to vector<2x1024xf32>
    %c84 = arith.constant 84 : index
    %33 = memref.load %arg1[%c84] : memref<100xf32, #tpu.memory_space<smem>>
    %34 = vector.broadcast %33 : f32 to vector<2x1024xf32>
    %c5 = arith.constant 5 : index
    %35 = memref.load %arg1[%c5] : memref<100xf32, #tpu.memory_space<smem>>
    %36 = vector.broadcast %35 : f32 to vector<2x1024xf32>
    %37 = arith.cmpf oge, %24, %36 : vector<2x1024xf32>
    %38 = arith.extui %37 : vector<2x1024xi1> to vector<2x1024xi32>
    %39 = arith.sitofp %38 : vector<2x1024xi32> to vector<2x1024xf32>
    %c21 = arith.constant 21 : index
    %40 = memref.load %arg1[%c21] : memref<100xf32, #tpu.memory_space<smem>>
    %41 = vector.broadcast %40 : f32 to vector<2x1024xf32>
    %42 = arith.mulf %39, %41 : vector<2x1024xf32>
    %43 = arith.addf %26, %42 : vector<2x1024xf32>
    %c37 = arith.constant 37 : index
    %44 = memref.load %arg1[%c37] : memref<100xf32, #tpu.memory_space<smem>>
    %45 = vector.broadcast %44 : f32 to vector<2x1024xf32>
    %46 = arith.mulf %39, %45 : vector<2x1024xf32>
    %47 = arith.addf %28, %46 : vector<2x1024xf32>
    %c53 = arith.constant 53 : index
    %48 = memref.load %arg1[%c53] : memref<100xf32, #tpu.memory_space<smem>>
    %49 = vector.broadcast %48 : f32 to vector<2x1024xf32>
    %50 = arith.mulf %39, %49 : vector<2x1024xf32>
    %51 = arith.addf %30, %50 : vector<2x1024xf32>
    %c69 = arith.constant 69 : index
    %52 = memref.load %arg1[%c69] : memref<100xf32, #tpu.memory_space<smem>>
    %53 = vector.broadcast %52 : f32 to vector<2x1024xf32>
    %54 = arith.mulf %39, %53 : vector<2x1024xf32>
    %55 = arith.addf %32, %54 : vector<2x1024xf32>
    %c85 = arith.constant 85 : index
    %56 = memref.load %arg1[%c85] : memref<100xf32, #tpu.memory_space<smem>>
    %57 = vector.broadcast %56 : f32 to vector<2x1024xf32>
    %58 = arith.mulf %39, %57 : vector<2x1024xf32>
    %59 = arith.addf %34, %58 : vector<2x1024xf32>
    %c6 = arith.constant 6 : index
    %60 = memref.load %arg1[%c6] : memref<100xf32, #tpu.memory_space<smem>>
    %61 = vector.broadcast %60 : f32 to vector<2x1024xf32>
    %62 = arith.cmpf oge, %24, %61 : vector<2x1024xf32>
    %63 = arith.extui %62 : vector<2x1024xi1> to vector<2x1024xi32>
    %64 = arith.sitofp %63 : vector<2x1024xi32> to vector<2x1024xf32>
    %c22 = arith.constant 22 : index
    %65 = memref.load %arg1[%c22] : memref<100xf32, #tpu.memory_space<smem>>
    %66 = vector.broadcast %65 : f32 to vector<2x1024xf32>
    %67 = arith.mulf %64, %66 : vector<2x1024xf32>
    %68 = arith.addf %43, %67 : vector<2x1024xf32>
    %c38 = arith.constant 38 : index
    %69 = memref.load %arg1[%c38] : memref<100xf32, #tpu.memory_space<smem>>
    %70 = vector.broadcast %69 : f32 to vector<2x1024xf32>
    %71 = arith.mulf %64, %70 : vector<2x1024xf32>
    %72 = arith.addf %47, %71 : vector<2x1024xf32>
    %c54 = arith.constant 54 : index
    %73 = memref.load %arg1[%c54] : memref<100xf32, #tpu.memory_space<smem>>
    %74 = vector.broadcast %73 : f32 to vector<2x1024xf32>
    %75 = arith.mulf %64, %74 : vector<2x1024xf32>
    %76 = arith.addf %51, %75 : vector<2x1024xf32>
    %c70 = arith.constant 70 : index
    %77 = memref.load %arg1[%c70] : memref<100xf32, #tpu.memory_space<smem>>
    %78 = vector.broadcast %77 : f32 to vector<2x1024xf32>
    %79 = arith.mulf %64, %78 : vector<2x1024xf32>
    %80 = arith.addf %55, %79 : vector<2x1024xf32>
    %c86 = arith.constant 86 : index
    %81 = memref.load %arg1[%c86] : memref<100xf32, #tpu.memory_space<smem>>
    %82 = vector.broadcast %81 : f32 to vector<2x1024xf32>
    %83 = arith.mulf %64, %82 : vector<2x1024xf32>
    %84 = arith.addf %59, %83 : vector<2x1024xf32>
    %c7 = arith.constant 7 : index
    %85 = memref.load %arg1[%c7] : memref<100xf32, #tpu.memory_space<smem>>
    %86 = vector.broadcast %85 : f32 to vector<2x1024xf32>
    %87 = arith.cmpf oge, %24, %86 : vector<2x1024xf32>
    %88 = arith.extui %87 : vector<2x1024xi1> to vector<2x1024xi32>
    %89 = arith.sitofp %88 : vector<2x1024xi32> to vector<2x1024xf32>
    %c23 = arith.constant 23 : index
    %90 = memref.load %arg1[%c23] : memref<100xf32, #tpu.memory_space<smem>>
    %91 = vector.broadcast %90 : f32 to vector<2x1024xf32>
    %92 = arith.mulf %89, %91 : vector<2x1024xf32>
    %93 = arith.addf %68, %92 : vector<2x1024xf32>
    %c39 = arith.constant 39 : index
    %94 = memref.load %arg1[%c39] : memref<100xf32, #tpu.memory_space<smem>>
    %95 = vector.broadcast %94 : f32 to vector<2x1024xf32>
    %96 = arith.mulf %89, %95 : vector<2x1024xf32>
    %97 = arith.addf %72, %96 : vector<2x1024xf32>
    %c55 = arith.constant 55 : index
    %98 = memref.load %arg1[%c55] : memref<100xf32, #tpu.memory_space<smem>>
    %99 = vector.broadcast %98 : f32 to vector<2x1024xf32>
    %100 = arith.mulf %89, %99 : vector<2x1024xf32>
    %101 = arith.addf %76, %100 : vector<2x1024xf32>
    %c71 = arith.constant 71 : index
    %102 = memref.load %arg1[%c71] : memref<100xf32, #tpu.memory_space<smem>>
    %103 = vector.broadcast %102 : f32 to vector<2x1024xf32>
    %104 = arith.mulf %89, %103 : vector<2x1024xf32>
    %105 = arith.addf %80, %104 : vector<2x1024xf32>
    %c87 = arith.constant 87 : index
    %106 = memref.load %arg1[%c87] : memref<100xf32, #tpu.memory_space<smem>>
    %107 = vector.broadcast %106 : f32 to vector<2x1024xf32>
    %108 = arith.mulf %89, %107 : vector<2x1024xf32>
    %109 = arith.addf %84, %108 : vector<2x1024xf32>
    %c8 = arith.constant 8 : index
    %110 = memref.load %arg1[%c8] : memref<100xf32, #tpu.memory_space<smem>>
    %111 = vector.broadcast %110 : f32 to vector<2x1024xf32>
    %112 = arith.cmpf oge, %24, %111 : vector<2x1024xf32>
    %113 = arith.extui %112 : vector<2x1024xi1> to vector<2x1024xi32>
    %114 = arith.sitofp %113 : vector<2x1024xi32> to vector<2x1024xf32>
    %c24 = arith.constant 24 : index
    %115 = memref.load %arg1[%c24] : memref<100xf32, #tpu.memory_space<smem>>
    %116 = vector.broadcast %115 : f32 to vector<2x1024xf32>
    %117 = arith.mulf %114, %116 : vector<2x1024xf32>
    %118 = arith.addf %93, %117 : vector<2x1024xf32>
    %c40 = arith.constant 40 : index
    %119 = memref.load %arg1[%c40] : memref<100xf32, #tpu.memory_space<smem>>
    %120 = vector.broadcast %119 : f32 to vector<2x1024xf32>
    %121 = arith.mulf %114, %120 : vector<2x1024xf32>
    %122 = arith.addf %97, %121 : vector<2x1024xf32>
    %c56 = arith.constant 56 : index
    %123 = memref.load %arg1[%c56] : memref<100xf32, #tpu.memory_space<smem>>
    %124 = vector.broadcast %123 : f32 to vector<2x1024xf32>
    %125 = arith.mulf %114, %124 : vector<2x1024xf32>
    %126 = arith.addf %101, %125 : vector<2x1024xf32>
    %c72 = arith.constant 72 : index
    %127 = memref.load %arg1[%c72] : memref<100xf32, #tpu.memory_space<smem>>
    %128 = vector.broadcast %127 : f32 to vector<2x1024xf32>
    %129 = arith.mulf %114, %128 : vector<2x1024xf32>
    %130 = arith.addf %105, %129 : vector<2x1024xf32>
    %c88 = arith.constant 88 : index
    %131 = memref.load %arg1[%c88] : memref<100xf32, #tpu.memory_space<smem>>
    %132 = vector.broadcast %131 : f32 to vector<2x1024xf32>
    %133 = arith.mulf %114, %132 : vector<2x1024xf32>
    %134 = arith.addf %109, %133 : vector<2x1024xf32>
    %c9 = arith.constant 9 : index
    %135 = memref.load %arg1[%c9] : memref<100xf32, #tpu.memory_space<smem>>
    %136 = vector.broadcast %135 : f32 to vector<2x1024xf32>
    %137 = arith.cmpf oge, %24, %136 : vector<2x1024xf32>
    %138 = arith.extui %137 : vector<2x1024xi1> to vector<2x1024xi32>
    %139 = arith.sitofp %138 : vector<2x1024xi32> to vector<2x1024xf32>
    %c25 = arith.constant 25 : index
    %140 = memref.load %arg1[%c25] : memref<100xf32, #tpu.memory_space<smem>>
    %141 = vector.broadcast %140 : f32 to vector<2x1024xf32>
    %142 = arith.mulf %139, %141 : vector<2x1024xf32>
    %143 = arith.addf %118, %142 : vector<2x1024xf32>
    %c41 = arith.constant 41 : index
    %144 = memref.load %arg1[%c41] : memref<100xf32, #tpu.memory_space<smem>>
    %145 = vector.broadcast %144 : f32 to vector<2x1024xf32>
    %146 = arith.mulf %139, %145 : vector<2x1024xf32>
    %147 = arith.addf %122, %146 : vector<2x1024xf32>
    %c57 = arith.constant 57 : index
    %148 = memref.load %arg1[%c57] : memref<100xf32, #tpu.memory_space<smem>>
    %149 = vector.broadcast %148 : f32 to vector<2x1024xf32>
    %150 = arith.mulf %139, %149 : vector<2x1024xf32>
    %151 = arith.addf %126, %150 : vector<2x1024xf32>
    %c73 = arith.constant 73 : index
    %152 = memref.load %arg1[%c73] : memref<100xf32, #tpu.memory_space<smem>>
    %153 = vector.broadcast %152 : f32 to vector<2x1024xf32>
    %154 = arith.mulf %139, %153 : vector<2x1024xf32>
    %155 = arith.addf %130, %154 : vector<2x1024xf32>
    %c89 = arith.constant 89 : index
    %156 = memref.load %arg1[%c89] : memref<100xf32, #tpu.memory_space<smem>>
    %157 = vector.broadcast %156 : f32 to vector<2x1024xf32>
    %158 = arith.mulf %139, %157 : vector<2x1024xf32>
    %159 = arith.addf %134, %158 : vector<2x1024xf32>
    %c10 = arith.constant 10 : index
    %160 = memref.load %arg1[%c10] : memref<100xf32, #tpu.memory_space<smem>>
    %161 = vector.broadcast %160 : f32 to vector<2x1024xf32>
    %162 = arith.cmpf oge, %24, %161 : vector<2x1024xf32>
    %163 = arith.extui %162 : vector<2x1024xi1> to vector<2x1024xi32>
    %164 = arith.sitofp %163 : vector<2x1024xi32> to vector<2x1024xf32>
    %c26 = arith.constant 26 : index
    %165 = memref.load %arg1[%c26] : memref<100xf32, #tpu.memory_space<smem>>
    %166 = vector.broadcast %165 : f32 to vector<2x1024xf32>
    %167 = arith.mulf %164, %166 : vector<2x1024xf32>
    %168 = arith.addf %143, %167 : vector<2x1024xf32>
    %c42 = arith.constant 42 : index
    %169 = memref.load %arg1[%c42] : memref<100xf32, #tpu.memory_space<smem>>
    %170 = vector.broadcast %169 : f32 to vector<2x1024xf32>
    %171 = arith.mulf %164, %170 : vector<2x1024xf32>
    %172 = arith.addf %147, %171 : vector<2x1024xf32>
    %c58 = arith.constant 58 : index
    %173 = memref.load %arg1[%c58] : memref<100xf32, #tpu.memory_space<smem>>
    %174 = vector.broadcast %173 : f32 to vector<2x1024xf32>
    %175 = arith.mulf %164, %174 : vector<2x1024xf32>
    %176 = arith.addf %151, %175 : vector<2x1024xf32>
    %c74 = arith.constant 74 : index
    %177 = memref.load %arg1[%c74] : memref<100xf32, #tpu.memory_space<smem>>
    %178 = vector.broadcast %177 : f32 to vector<2x1024xf32>
    %179 = arith.mulf %164, %178 : vector<2x1024xf32>
    %180 = arith.addf %155, %179 : vector<2x1024xf32>
    %c90 = arith.constant 90 : index
    %181 = memref.load %arg1[%c90] : memref<100xf32, #tpu.memory_space<smem>>
    %182 = vector.broadcast %181 : f32 to vector<2x1024xf32>
    %183 = arith.mulf %164, %182 : vector<2x1024xf32>
    %184 = arith.addf %159, %183 : vector<2x1024xf32>
    %c11 = arith.constant 11 : index
    %185 = memref.load %arg1[%c11] : memref<100xf32, #tpu.memory_space<smem>>
    %186 = vector.broadcast %185 : f32 to vector<2x1024xf32>
    %187 = arith.cmpf oge, %24, %186 : vector<2x1024xf32>
    %188 = arith.extui %187 : vector<2x1024xi1> to vector<2x1024xi32>
    %189 = arith.sitofp %188 : vector<2x1024xi32> to vector<2x1024xf32>
    %c27 = arith.constant 27 : index
    %190 = memref.load %arg1[%c27] : memref<100xf32, #tpu.memory_space<smem>>
    %191 = vector.broadcast %190 : f32 to vector<2x1024xf32>
    %192 = arith.mulf %189, %191 : vector<2x1024xf32>
    %193 = arith.addf %168, %192 : vector<2x1024xf32>
    %c43 = arith.constant 43 : index
    %194 = memref.load %arg1[%c43] : memref<100xf32, #tpu.memory_space<smem>>
    %195 = vector.broadcast %194 : f32 to vector<2x1024xf32>
    %196 = arith.mulf %189, %195 : vector<2x1024xf32>
    %197 = arith.addf %172, %196 : vector<2x1024xf32>
    %c59 = arith.constant 59 : index
    %198 = memref.load %arg1[%c59] : memref<100xf32, #tpu.memory_space<smem>>
    %199 = vector.broadcast %198 : f32 to vector<2x1024xf32>
    %200 = arith.mulf %189, %199 : vector<2x1024xf32>
    %201 = arith.addf %176, %200 : vector<2x1024xf32>
    %c75 = arith.constant 75 : index
    %202 = memref.load %arg1[%c75] : memref<100xf32, #tpu.memory_space<smem>>
    %203 = vector.broadcast %202 : f32 to vector<2x1024xf32>
    %204 = arith.mulf %189, %203 : vector<2x1024xf32>
    %205 = arith.addf %180, %204 : vector<2x1024xf32>
    %c91 = arith.constant 91 : index
    %206 = memref.load %arg1[%c91] : memref<100xf32, #tpu.memory_space<smem>>
    %207 = vector.broadcast %206 : f32 to vector<2x1024xf32>
    %208 = arith.mulf %189, %207 : vector<2x1024xf32>
    %209 = arith.addf %184, %208 : vector<2x1024xf32>
    %c12 = arith.constant 12 : index
    %210 = memref.load %arg1[%c12] : memref<100xf32, #tpu.memory_space<smem>>
    %211 = vector.broadcast %210 : f32 to vector<2x1024xf32>
    %212 = arith.cmpf oge, %24, %211 : vector<2x1024xf32>
    %213 = arith.extui %212 : vector<2x1024xi1> to vector<2x1024xi32>
    %214 = arith.sitofp %213 : vector<2x1024xi32> to vector<2x1024xf32>
    %c28 = arith.constant 28 : index
    %215 = memref.load %arg1[%c28] : memref<100xf32, #tpu.memory_space<smem>>
    %216 = vector.broadcast %215 : f32 to vector<2x1024xf32>
    %217 = arith.mulf %214, %216 : vector<2x1024xf32>
    %218 = arith.addf %193, %217 : vector<2x1024xf32>
    %c44 = arith.constant 44 : index
    %219 = memref.load %arg1[%c44] : memref<100xf32, #tpu.memory_space<smem>>
    %220 = vector.broadcast %219 : f32 to vector<2x1024xf32>
    %221 = arith.mulf %214, %220 : vector<2x1024xf32>
    %222 = arith.addf %197, %221 : vector<2x1024xf32>
    %c60 = arith.constant 60 : index
    %223 = memref.load %arg1[%c60] : memref<100xf32, #tpu.memory_space<smem>>
    %224 = vector.broadcast %223 : f32 to vector<2x1024xf32>
    %225 = arith.mulf %214, %224 : vector<2x1024xf32>
    %226 = arith.addf %201, %225 : vector<2x1024xf32>
    %c76 = arith.constant 76 : index
    %227 = memref.load %arg1[%c76] : memref<100xf32, #tpu.memory_space<smem>>
    %228 = vector.broadcast %227 : f32 to vector<2x1024xf32>
    %229 = arith.mulf %214, %228 : vector<2x1024xf32>
    %230 = arith.addf %205, %229 : vector<2x1024xf32>
    %c92 = arith.constant 92 : index
    %231 = memref.load %arg1[%c92] : memref<100xf32, #tpu.memory_space<smem>>
    %232 = vector.broadcast %231 : f32 to vector<2x1024xf32>
    %233 = arith.mulf %214, %232 : vector<2x1024xf32>
    %234 = arith.addf %209, %233 : vector<2x1024xf32>
    %c13 = arith.constant 13 : index
    %235 = memref.load %arg1[%c13] : memref<100xf32, #tpu.memory_space<smem>>
    %236 = vector.broadcast %235 : f32 to vector<2x1024xf32>
    %237 = arith.cmpf oge, %24, %236 : vector<2x1024xf32>
    %238 = arith.extui %237 : vector<2x1024xi1> to vector<2x1024xi32>
    %239 = arith.sitofp %238 : vector<2x1024xi32> to vector<2x1024xf32>
    %c29 = arith.constant 29 : index
    %240 = memref.load %arg1[%c29] : memref<100xf32, #tpu.memory_space<smem>>
    %241 = vector.broadcast %240 : f32 to vector<2x1024xf32>
    %242 = arith.mulf %239, %241 : vector<2x1024xf32>
    %243 = arith.addf %218, %242 : vector<2x1024xf32>
    %c45 = arith.constant 45 : index
    %244 = memref.load %arg1[%c45] : memref<100xf32, #tpu.memory_space<smem>>
    %245 = vector.broadcast %244 : f32 to vector<2x1024xf32>
    %246 = arith.mulf %239, %245 : vector<2x1024xf32>
    %247 = arith.addf %222, %246 : vector<2x1024xf32>
    %c61 = arith.constant 61 : index
    %248 = memref.load %arg1[%c61] : memref<100xf32, #tpu.memory_space<smem>>
    %249 = vector.broadcast %248 : f32 to vector<2x1024xf32>
    %250 = arith.mulf %239, %249 : vector<2x1024xf32>
    %251 = arith.addf %226, %250 : vector<2x1024xf32>
    %c77 = arith.constant 77 : index
    %252 = memref.load %arg1[%c77] : memref<100xf32, #tpu.memory_space<smem>>
    %253 = vector.broadcast %252 : f32 to vector<2x1024xf32>
    %254 = arith.mulf %239, %253 : vector<2x1024xf32>
    %255 = arith.addf %230, %254 : vector<2x1024xf32>
    %c93 = arith.constant 93 : index
    %256 = memref.load %arg1[%c93] : memref<100xf32, #tpu.memory_space<smem>>
    %257 = vector.broadcast %256 : f32 to vector<2x1024xf32>
    %258 = arith.mulf %239, %257 : vector<2x1024xf32>
    %259 = arith.addf %234, %258 : vector<2x1024xf32>
    %c14 = arith.constant 14 : index
    %260 = memref.load %arg1[%c14] : memref<100xf32, #tpu.memory_space<smem>>
    %261 = vector.broadcast %260 : f32 to vector<2x1024xf32>
    %262 = arith.cmpf oge, %24, %261 : vector<2x1024xf32>
    %263 = arith.extui %262 : vector<2x1024xi1> to vector<2x1024xi32>
    %264 = arith.sitofp %263 : vector<2x1024xi32> to vector<2x1024xf32>
    %c30 = arith.constant 30 : index
    %265 = memref.load %arg1[%c30] : memref<100xf32, #tpu.memory_space<smem>>
    %266 = vector.broadcast %265 : f32 to vector<2x1024xf32>
    %267 = arith.mulf %264, %266 : vector<2x1024xf32>
    %268 = arith.addf %243, %267 : vector<2x1024xf32>
    %c46 = arith.constant 46 : index
    %269 = memref.load %arg1[%c46] : memref<100xf32, #tpu.memory_space<smem>>
    %270 = vector.broadcast %269 : f32 to vector<2x1024xf32>
    %271 = arith.mulf %264, %270 : vector<2x1024xf32>
    %272 = arith.addf %247, %271 : vector<2x1024xf32>
    %c62 = arith.constant 62 : index
    %273 = memref.load %arg1[%c62] : memref<100xf32, #tpu.memory_space<smem>>
    %274 = vector.broadcast %273 : f32 to vector<2x1024xf32>
    %275 = arith.mulf %264, %274 : vector<2x1024xf32>
    %276 = arith.addf %251, %275 : vector<2x1024xf32>
    %c78 = arith.constant 78 : index
    %277 = memref.load %arg1[%c78] : memref<100xf32, #tpu.memory_space<smem>>
    %278 = vector.broadcast %277 : f32 to vector<2x1024xf32>
    %279 = arith.mulf %264, %278 : vector<2x1024xf32>
    %280 = arith.addf %255, %279 : vector<2x1024xf32>
    %c94 = arith.constant 94 : index
    %281 = memref.load %arg1[%c94] : memref<100xf32, #tpu.memory_space<smem>>
    %282 = vector.broadcast %281 : f32 to vector<2x1024xf32>
    %283 = arith.mulf %264, %282 : vector<2x1024xf32>
    %284 = arith.addf %259, %283 : vector<2x1024xf32>
    %c15 = arith.constant 15 : index
    %285 = memref.load %arg1[%c15] : memref<100xf32, #tpu.memory_space<smem>>
    %286 = vector.broadcast %285 : f32 to vector<2x1024xf32>
    %287 = arith.cmpf oge, %24, %286 : vector<2x1024xf32>
    %288 = arith.extui %287 : vector<2x1024xi1> to vector<2x1024xi32>
    %289 = arith.sitofp %288 : vector<2x1024xi32> to vector<2x1024xf32>
    %c31 = arith.constant 31 : index
    %290 = memref.load %arg1[%c31] : memref<100xf32, #tpu.memory_space<smem>>
    %291 = vector.broadcast %290 : f32 to vector<2x1024xf32>
    %292 = arith.mulf %289, %291 : vector<2x1024xf32>
    %293 = arith.addf %268, %292 : vector<2x1024xf32>
    %c47 = arith.constant 47 : index
    %294 = memref.load %arg1[%c47] : memref<100xf32, #tpu.memory_space<smem>>
    %295 = vector.broadcast %294 : f32 to vector<2x1024xf32>
    %296 = arith.mulf %289, %295 : vector<2x1024xf32>
    %297 = arith.addf %272, %296 : vector<2x1024xf32>
    %c63 = arith.constant 63 : index
    %298 = memref.load %arg1[%c63] : memref<100xf32, #tpu.memory_space<smem>>
    %299 = vector.broadcast %298 : f32 to vector<2x1024xf32>
    %300 = arith.mulf %289, %299 : vector<2x1024xf32>
    %301 = arith.addf %276, %300 : vector<2x1024xf32>
    %c79 = arith.constant 79 : index
    %302 = memref.load %arg1[%c79] : memref<100xf32, #tpu.memory_space<smem>>
    %303 = vector.broadcast %302 : f32 to vector<2x1024xf32>
    %304 = arith.mulf %289, %303 : vector<2x1024xf32>
    %305 = arith.addf %280, %304 : vector<2x1024xf32>
    %c95 = arith.constant 95 : index
    %306 = memref.load %arg1[%c95] : memref<100xf32, #tpu.memory_space<smem>>
    %307 = vector.broadcast %306 : f32 to vector<2x1024xf32>
    %308 = arith.mulf %289, %307 : vector<2x1024xf32>
    %309 = arith.addf %284, %308 : vector<2x1024xf32>
    %c16 = arith.constant 16 : index
    %310 = memref.load %arg1[%c16] : memref<100xf32, #tpu.memory_space<smem>>
    %311 = vector.broadcast %310 : f32 to vector<2x1024xf32>
    %312 = arith.cmpf oge, %24, %311 : vector<2x1024xf32>
    %313 = arith.extui %312 : vector<2x1024xi1> to vector<2x1024xi32>
    %314 = arith.sitofp %313 : vector<2x1024xi32> to vector<2x1024xf32>
    %c32 = arith.constant 32 : index
    %315 = memref.load %arg1[%c32] : memref<100xf32, #tpu.memory_space<smem>>
    %316 = vector.broadcast %315 : f32 to vector<2x1024xf32>
    %317 = arith.mulf %314, %316 : vector<2x1024xf32>
    %318 = arith.addf %293, %317 : vector<2x1024xf32>
    %c48 = arith.constant 48 : index
    %319 = memref.load %arg1[%c48] : memref<100xf32, #tpu.memory_space<smem>>
    %320 = vector.broadcast %319 : f32 to vector<2x1024xf32>
    %321 = arith.mulf %314, %320 : vector<2x1024xf32>
    %322 = arith.addf %297, %321 : vector<2x1024xf32>
    %c64 = arith.constant 64 : index
    %323 = memref.load %arg1[%c64] : memref<100xf32, #tpu.memory_space<smem>>
    %324 = vector.broadcast %323 : f32 to vector<2x1024xf32>
    %325 = arith.mulf %314, %324 : vector<2x1024xf32>
    %326 = arith.addf %301, %325 : vector<2x1024xf32>
    %c80 = arith.constant 80 : index
    %327 = memref.load %arg1[%c80] : memref<100xf32, #tpu.memory_space<smem>>
    %328 = vector.broadcast %327 : f32 to vector<2x1024xf32>
    %329 = arith.mulf %314, %328 : vector<2x1024xf32>
    %330 = arith.addf %305, %329 : vector<2x1024xf32>
    %c96 = arith.constant 96 : index
    %331 = memref.load %arg1[%c96] : memref<100xf32, #tpu.memory_space<smem>>
    %332 = vector.broadcast %331 : f32 to vector<2x1024xf32>
    %333 = arith.mulf %314, %332 : vector<2x1024xf32>
    %334 = arith.addf %309, %333 : vector<2x1024xf32>
    %c17 = arith.constant 17 : index
    %335 = memref.load %arg1[%c17] : memref<100xf32, #tpu.memory_space<smem>>
    %336 = vector.broadcast %335 : f32 to vector<2x1024xf32>
    %337 = arith.cmpf oge, %24, %336 : vector<2x1024xf32>
    %338 = arith.extui %337 : vector<2x1024xi1> to vector<2x1024xi32>
    %339 = arith.sitofp %338 : vector<2x1024xi32> to vector<2x1024xf32>
    %c33 = arith.constant 33 : index
    %340 = memref.load %arg1[%c33] : memref<100xf32, #tpu.memory_space<smem>>
    %341 = vector.broadcast %340 : f32 to vector<2x1024xf32>
    %342 = arith.mulf %339, %341 : vector<2x1024xf32>
    %343 = arith.addf %318, %342 : vector<2x1024xf32>
    %c49 = arith.constant 49 : index
    %344 = memref.load %arg1[%c49] : memref<100xf32, #tpu.memory_space<smem>>
    %345 = vector.broadcast %344 : f32 to vector<2x1024xf32>
    %346 = arith.mulf %339, %345 : vector<2x1024xf32>
    %347 = arith.addf %322, %346 : vector<2x1024xf32>
    %c65 = arith.constant 65 : index
    %348 = memref.load %arg1[%c65] : memref<100xf32, #tpu.memory_space<smem>>
    %349 = vector.broadcast %348 : f32 to vector<2x1024xf32>
    %350 = arith.mulf %339, %349 : vector<2x1024xf32>
    %351 = arith.addf %326, %350 : vector<2x1024xf32>
    %c81 = arith.constant 81 : index
    %352 = memref.load %arg1[%c81] : memref<100xf32, #tpu.memory_space<smem>>
    %353 = vector.broadcast %352 : f32 to vector<2x1024xf32>
    %354 = arith.mulf %339, %353 : vector<2x1024xf32>
    %355 = arith.addf %330, %354 : vector<2x1024xf32>
    %c97 = arith.constant 97 : index
    %356 = memref.load %arg1[%c97] : memref<100xf32, #tpu.memory_space<smem>>
    %357 = vector.broadcast %356 : f32 to vector<2x1024xf32>
    %358 = arith.mulf %339, %357 : vector<2x1024xf32>
    %359 = arith.addf %334, %358 : vector<2x1024xf32>
    %c18 = arith.constant 18 : index
    %360 = memref.load %arg1[%c18] : memref<100xf32, #tpu.memory_space<smem>>
    %361 = vector.broadcast %360 : f32 to vector<2x1024xf32>
    %362 = arith.cmpf oge, %24, %361 : vector<2x1024xf32>
    %363 = arith.extui %362 : vector<2x1024xi1> to vector<2x1024xi32>
    %364 = arith.sitofp %363 : vector<2x1024xi32> to vector<2x1024xf32>
    %c34 = arith.constant 34 : index
    %365 = memref.load %arg1[%c34] : memref<100xf32, #tpu.memory_space<smem>>
    %366 = vector.broadcast %365 : f32 to vector<2x1024xf32>
    %367 = arith.mulf %364, %366 : vector<2x1024xf32>
    %368 = arith.addf %343, %367 : vector<2x1024xf32>
    %c50 = arith.constant 50 : index
    %369 = memref.load %arg1[%c50] : memref<100xf32, #tpu.memory_space<smem>>
    %370 = vector.broadcast %369 : f32 to vector<2x1024xf32>
    %371 = arith.mulf %364, %370 : vector<2x1024xf32>
    %372 = arith.addf %347, %371 : vector<2x1024xf32>
    %c66 = arith.constant 66 : index
    %373 = memref.load %arg1[%c66] : memref<100xf32, #tpu.memory_space<smem>>
    %374 = vector.broadcast %373 : f32 to vector<2x1024xf32>
    %375 = arith.mulf %364, %374 : vector<2x1024xf32>
    %376 = arith.addf %351, %375 : vector<2x1024xf32>
    %c82 = arith.constant 82 : index
    %377 = memref.load %arg1[%c82] : memref<100xf32, #tpu.memory_space<smem>>
    %378 = vector.broadcast %377 : f32 to vector<2x1024xf32>
    %379 = arith.mulf %364, %378 : vector<2x1024xf32>
    %380 = arith.addf %355, %379 : vector<2x1024xf32>
    %c98 = arith.constant 98 : index
    %381 = memref.load %arg1[%c98] : memref<100xf32, #tpu.memory_space<smem>>
    %382 = vector.broadcast %381 : f32 to vector<2x1024xf32>
    %383 = arith.mulf %364, %382 : vector<2x1024xf32>
    %384 = arith.addf %359, %383 : vector<2x1024xf32>
    %c19 = arith.constant 19 : index
    %385 = memref.load %arg1[%c19] : memref<100xf32, #tpu.memory_space<smem>>
    %386 = vector.broadcast %385 : f32 to vector<2x1024xf32>
    %387 = arith.cmpf oge, %24, %386 : vector<2x1024xf32>
    %388 = arith.extui %387 : vector<2x1024xi1> to vector<2x1024xi32>
    %389 = arith.sitofp %388 : vector<2x1024xi32> to vector<2x1024xf32>
    %c35 = arith.constant 35 : index
    %390 = memref.load %arg1[%c35] : memref<100xf32, #tpu.memory_space<smem>>
    %391 = vector.broadcast %390 : f32 to vector<2x1024xf32>
    %392 = arith.mulf %389, %391 : vector<2x1024xf32>
    %393 = arith.addf %368, %392 : vector<2x1024xf32>
    %c51 = arith.constant 51 : index
    %394 = memref.load %arg1[%c51] : memref<100xf32, #tpu.memory_space<smem>>
    %395 = vector.broadcast %394 : f32 to vector<2x1024xf32>
    %396 = arith.mulf %389, %395 : vector<2x1024xf32>
    %397 = arith.addf %372, %396 : vector<2x1024xf32>
    %c67 = arith.constant 67 : index
    %398 = memref.load %arg1[%c67] : memref<100xf32, #tpu.memory_space<smem>>
    %399 = vector.broadcast %398 : f32 to vector<2x1024xf32>
    %400 = arith.mulf %389, %399 : vector<2x1024xf32>
    %401 = arith.addf %376, %400 : vector<2x1024xf32>
    %c83 = arith.constant 83 : index
    %402 = memref.load %arg1[%c83] : memref<100xf32, #tpu.memory_space<smem>>
    %403 = vector.broadcast %402 : f32 to vector<2x1024xf32>
    %404 = arith.mulf %389, %403 : vector<2x1024xf32>
    %405 = arith.addf %380, %404 : vector<2x1024xf32>
    %c99 = arith.constant 99 : index
    %406 = memref.load %arg1[%c99] : memref<100xf32, #tpu.memory_space<smem>>
    %407 = vector.broadcast %406 : f32 to vector<2x1024xf32>
    %408 = arith.mulf %389, %407 : vector<2x1024xf32>
    %409 = arith.addf %384, %408 : vector<2x1024xf32>
    %410 = arith.subf %24, %393 : vector<2x1024xf32>
    %411 = arith.mulf %409, %410 : vector<2x1024xf32>
    %412 = arith.addf %411, %405 : vector<2x1024xf32>
    %413 = arith.mulf %412, %410 : vector<2x1024xf32>
    %414 = arith.addf %413, %401 : vector<2x1024xf32>
    %415 = arith.mulf %414, %410 : vector<2x1024xf32>
    %416 = arith.addf %415, %397 : vector<2x1024xf32>
    %417 = arith.select %3, %17, %416 : vector<2x1024xi1>, vector<2x1024xf32>
    %c0_2 = arith.constant 0 : index
    %c0_3 = arith.constant 0 : index
    %418 = vector.load %arg3[%c0_2, %c0_3] : memref<2x1024xf32, #tpu.memory_space<vmem>>, vector<2x1024xf32>
    tpu.vector_store %arg3[%c0_2, %c0_3], %417 {strides = array<i32>} : memref<2x1024xf32, #tpu.memory_space<vmem>>, vector<2x1024xf32>,
    return
  }
  func.func @transform_0(%arg0: i32) -> i32 {
    %c0_i32 = arith.constant 0 : i32
    %c0_i32_0 = arith.constant 0 : i32
    return %c0_i32 : i32
  }
  func.func @transform_1(%arg0: i32) -> (i32, i32) {
    %c0_i32 = arith.constant 0 : i32
    %c0_i32_0 = arith.constant 0 : i32
    return %arg0, %c0_i32 : i32, i32
  }
  func.func @transform_2(%arg0: i32) -> (i32, i32) {
    %c0_i32 = arith.constant 0 : i32
    %c0_i32_0 = arith.constant 0 : i32
    return %arg0, %c0_i32 : i32, i32
  }
}

</mosaic_0001>

<bundles_post_ra>
// kernel: tpu_custom_call.1
= control target key start
LH: loop header
LB: loop body
LE: loop exit
PB: predicated region body
PF: predicated region fallthrough
CT: control target
= control target key end

     0   :  { %7 = vsyncpa [#allocation5], 0  ;;  %s1327_s0 = inlined_call_operand.hbm [shape: f32[100], index: 0, kind: input, shape index: {}]   ;;  %s1328_s1 = inlined_call_operand.hbm [shape: f32[2,1024], index: 1, kind: input, shape index: {}]   ;;  %s1329_s2 = inlined_call_operand.hbm [shape: f32[2,1024], index: 2, kind: output, shape index: {}]  }
   0x1   :  { %8 = vsyncpa [#allocation3], 0 }
   0x2   :  { %9 = vsyncpa [#allocation4], 0  ;;  %s15_s11 = sshll.u32 %s1327_s0, 4  ;;  %s24_s14 = sshll.u32 %s1328_s1, 4  ;;  %s16_s11 = int_to_ptr.hbm [resolvable:$true] %s15_s11  ;;  %s25_s14 = int_to_ptr.hbm [resolvable:$true] %s24_s14 }
   0x3   :  { %s896_s15 = smov [#allocation2]   ;;  %s897_s16 = smov [#allocation6]  }
   0x4   :  { %18 = dma.hbm_to_smem %s16_s11, 16, %s896_s15, [#allocation5]  }
   0x5   :  { %s26_s17 = sshll.u32 %s897_s16, 4  ;;  %s27_s17 = int_to_ptr.vmem [resolvable:$true] %s26_s17 }
   0x6   :  { %29 = dma.hbm_to_vmem [thread:$0]  %s25_s14, 256, %s27_s17, [#allocation3]  }
   0x7   :  { %890 = dma.done.wait [#allocation5], 16  }
   0x8   :  { %891 = vsyncadd [#allocation5], 4294967280 }
   0x9   :  { %892 = dma.done.wait [#allocation3], 256  }
   0xa   :  { %893 = vsyncadd [#allocation3], 4294967040 }
   0xb   :  { %38 = sfence }
   0xc   :  { %s41_s18 = sld [smem:[#allocation2]]  ;;  %v921_v0 = vld [vmem:[#allocation6] sm:$0xff]  ;;  %v923_v1 = vld [vmem:[#allocation6 + $0x8] sm:$0xff]  ;;  %v898_v20 = vmov 0.0  }
   0xd   :  { %s691_s0 = sld [smem:[#allocation2 + $0x4]] }
   0xe   :  { %s931_s1 = sld [smem:[#allocation2 + $0x3]] }
   0xf   :  { %s933_s19 = sld [smem:[#allocation2 + $0x2]] }
  0x10   :  { %s945_s20 = sld [smem:[#allocation2 + $0x14]] }
  0x11   :  { %s947_s21 = sld [smem:[#allocation2 + $0x24]] }
  0x12   :  { %v925_v2 = vstv %s41_s18  ;;  %s700_s22 = sld [smem:[#allocation2 + $0x5]] }
  0x13   :  { %vm43_vm0 = vcmp.lt.f32.partialorder %v921_v0, %v925_v2  ;;  %vm44_vm1 = vcmp.lt.f32.partialorder %v923_v1, %v925_v2  ;;  %s949_s23 = sld [smem:[#allocation2 + $0x34]]  ;;  %v46_v5 = vstv %s691_s0 }
  0x14   :  { %v65_v3 = vsel %vm43_vm0, %v925_v2, %v921_v0  ;;  %v66_v4 = vsel %vm44_vm1, %v925_v2, %v923_v1  ;;  %s951_s24 = sld [smem:[#allocation2 + $0x44]]  ;;  %v47_v9 = vmul.f32 %v46_v5, %v921_v0  ;;  %v48_v11 = vmul.f32 %v46_v5, %v923_v1 }
  0x15   :  { %824 = vrcp.f32 %v65_v3  ;;  %s953_s25 = sld [smem:[#allocation2 + $0x15]]  ;;  %v50_v12 = vstv %s931_s1  ;;  %v56_v24 = vstv %s933_s19  ;;  %s899_s19 = smov [#allocation7]  }
  0x16   :  { %826 = vrcp.f32 %v66_v4  ;;  %s955_s26 = sld [smem:[#allocation2 + $0x25]]  ;;  %v51_v17 = vadd.f32 %v50_v12, %v47_v9  ;;  %v52_v19 = vadd.f32 %v50_v12, %v48_v11  ;;  %v76_v27 = vstv %s945_s20 }
  0x17   :  { %s957_s27 = sld [smem:[#allocation2 + $0x6]]  ;;  %v78_v31 = vstv %s947_s21 }
  0x18   :  { %s960_s28 = sld [smem:[#allocation2 + $0x35]]  ;;  %v86_v15 = vstv %s700_s22  ;;  %v988_v26 = vmul.f32 %v51_v17, %v921_v0  ;;  %v996_v30 = vmul.f32 %v52_v19, %v923_v1 }
  0x19   :  { %s964_s29 = sld [smem:[#allocation2 + $0x54]]  ;;  %v80_v33 = vstv %s949_s23 }
  0x1a   :  { %s966_s30 = sld [smem:[#allocation2 + $0x45]]  ;;  %v82_v36 = vstv %s951_s24 }
  0x1b   :  { %v825_v6 = vpop.eup %824  ;;  %s970_s3 = sld [smem:[#allocation2 + $0x55]]  ;;  %v94_v22 = vstv %s953_s25 }
  0x1c   :  { %v827_v7 = vpop.eup %826  ;;  %v69_v8 = vmul.f32 %v825_v6, %v65_v3  ;;  %s974_s4 = sld [smem:[#allocation2 + $0x16]]  ;;  %v100_v25 = vstv %s955_s26 }
  0x1d   :  { %v70_v10 = vmul.f32 %v827_v7, %v66_v4  ;;  %s977_s5 = sld [smem:[#allocation2 + $0x26]]  ;;  %v124_v23 = vstv %s957_s27 }
  0x1e   :  { %v71_v13 = vsub.f32 2.0, %v69_v8  ;;  %s983_s6 = sld [smem:[#allocation2 + $0x36]]  ;;  %v106_v29 = vstv %s960_s28 }
  0x1f   :  { %v72_v14 = vsub.f32 2.0, %v70_v10  ;;  %s993_s7 = sld [smem:[#allocation2 + $0x46]]  ;;  %v84_v44 = vstv %s964_s29 }
  0x20   :  { %v968_v16 = vmul.f32 %v825_v6, %v71_v13  ;;  %s1000_s8 = sld [smem:[#allocation2 + $0x56]]  ;;  %v112_v35 = vstv %s966_s30 }
  0x21   :  { %v972_v18 = vmul.f32 %v827_v7, %v72_v14  ;;  %s1005_s9 = sld [smem:[#allocation2 + $0x7]]  ;;  %v118_v39 = vstv %s970_s3 }
  0x22   :  { %vm87_vm2 = vcmp.ge.f32.partialorder %v968_v16, %v86_v15  ;;  %vm125_vm4 = vcmp.ge.f32.partialorder %v968_v16, %v124_v23  ;;  %s1009_s10 = sld [smem:[#allocation2 + $0x17]]  ;;  %v132_v43 = vstv %s974_s4 }
  0x23   :  { %vm88_vm3 = vcmp.ge.f32.partialorder %v972_v18, %v86_v15  ;;  %v701_v21 = vsel %vm87_vm2, 1.0, %v898_v20  ;;  %vm126_vm5 = vcmp.ge.f32.partialorder %v972_v18, %v124_v23  ;;  %v709_v42 = vsel %vm125_vm4, 1.0, %v898_v20  ;;  %s1013_s11 = sld [smem:[#allocation2 + $0x27]] }
  0x24   :  { %v702_v28 = vsel %vm88_vm3, 1.0, %v898_v20  ;;  %v95_v32 = vmul.f32 %v701_v21, %v94_v22  ;;  %v101_v34 = vmul.f32 %v701_v21, %v100_v25  ;;  %v107_v38 = vmul.f32 %v701_v21, %v106_v29  ;;  %s1017_s12 = sld [smem:[#allocation2 + $0x37]] }
  0x25   :  { %v96_v37 = vmul.f32 %v702_v28, %v94_v22  ;;  %v102_v40 = vmul.f32 %v702_v28, %v100_v25  ;;  %v108_v41 = vmul.f32 %v702_v28, %v106_v29  ;;  %v113_v46 = vmul.f32 %v701_v21, %v112_v35  ;;  %s1021_s13 = sld [smem:[#allocation2 + $0x47]] }
  0x26   :  { %v97_v45 = vadd.f32 %v95_v32, %v76_v27  ;;  %v710_v47 = vsel %vm126_vm5, 1.0, %v898_v20  ;;  %v103_v48 = vadd.f32 %v101_v34, %v78_v31  ;;  %v114_v49 = vmul.f32 %v702_v28, %v112_v35  ;;  %s1023_s14 = sld [smem:[#allocation2 + $0x8]] }
  0x27   :  { %v138_v50 = vstv %s977_s5  ;;  %v144_v51 = vstv %s983_s6  ;;  %v109_v52 = vadd.f32 %v107_v38, %v80_v33  ;;  %v119_v53 = vmul.f32 %v701_v21, %v118_v39  ;;  %s1025_s15 = sld [smem:[#allocation2 + $0x57]] }
  0x28   :  { %v120_v54 = vmul.f32 %v702_v28, %v118_v39  ;;  %v133_v55 = vmul.f32 %v709_v42, %v132_v43  ;;  %v98_v56 = vadd.f32 %v96_v37, %v76_v27  ;;  %v104_v57 = vadd.f32 %v102_v40, %v78_v31  ;;  %s1028_s16 = sld [smem:[#allocation2 + $0x18]] }
  0x29   :  { %v110_v58 = vadd.f32 %v108_v41, %v80_v33  ;;  %v134_v59 = vmul.f32 %v710_v47, %v132_v43  ;;  %v139_v60 = vmul.f32 %v709_v42, %v138_v50  ;;  %v140_v61 = vmul.f32 %v710_v47, %v138_v50  ;;  %s1034_s17 = sld [smem:[#allocation2 + $0x28]] }
  0x2a   :  { %v145_v62 = vmul.f32 %v709_v42, %v144_v51  ;;  %v150_v63 = vstv %s993_s7  ;;  %v115_v3 = vadd.f32 %v113_v46, %v82_v36  ;;  %v116_v4 = vadd.f32 %v114_v49, %v82_v36  ;;  %s1039_s18 = sld [smem:[#allocation2 + $0x38]] }
  0x2b   :  { %v146_v5 = vmul.f32 %v710_v47, %v144_v51  ;;  %v162_v6 = vstv %s1005_s9  ;;  %v121_v7 = vadd.f32 %v119_v53, %v84_v44  ;;  %v122_v8 = vadd.f32 %v120_v54, %v84_v44  ;;  %s1043_s0 = sld [smem:[#allocation2 + $0x48]] }
  0x2c   :  { %v135_v9 = vadd.f32 %v133_v55, %v97_v45  ;;  %v156_v10 = vstv %s1000_s8  ;;  %v151_v11 = vmul.f32 %v709_v42, %v150_v63  ;;  %v152_v12 = vmul.f32 %v710_v47, %v150_v63  ;;  %s1047_s1 = sld [smem:[#allocation2 + $0x58]] }
  0x2d   :  { %vm163_vm6 = vcmp.ge.f32.partialorder %v968_v16, %v162_v6  ;;  %vm164_vm7 = vcmp.ge.f32.partialorder %v972_v18, %v162_v6  ;;  %v136_v13 = vadd.f32 %v134_v59, %v98_v56  ;;  %v141_v14 = vadd.f32 %v139_v60, %v103_v48  ;;  %s1051_s20 = sld [smem:[#allocation2 + $0x9]] }
  0x2e   :  { %v142_v15 = vadd.f32 %v140_v61, %v104_v57  ;;  %v147_v17 = vadd.f32 %v145_v62, %v109_v52  ;;  %v148_v19 = vadd.f32 %v146_v5, %v110_v58  ;;  %v717_v21 = vsel %vm163_vm6, 1.0, %v898_v20  ;;  %s1056_s21 = sld [smem:[#allocation2 + $0x19]] }
  0x2f   :  { %v718_v22 = vsel %vm164_vm7, 1.0, %v898_v20  ;;  %v170_v23 = vstv %s1009_s10  ;;  %v157_v25 = vmul.f32 %v709_v42, %v156_v10  ;;  %v158_v27 = vmul.f32 %v710_v47, %v156_v10  ;;  %s1059_s22 = sld [smem:[#allocation2 + $0x29]] }
  0x30   :  { %v176_v28 = vstv %s1013_s11  ;;  %v200_v29 = vstv %s1023_s14  ;;  %v153_v31 = vadd.f32 %v151_v11, %v115_v3  ;;  %v154_v32 = vadd.f32 %v152_v12, %v116_v4  ;;  %s1062_s23 = sld [smem:[#allocation2 + $0xa]] }
  0x31   :  { %v182_v33 = vstv %s1017_s12  ;;  %v188_v34 = vstv %s1021_s13  ;;  %v171_v35 = vmul.f32 %v717_v21, %v170_v23  ;;  %v172_v36 = vmul.f32 %v718_v22, %v170_v23  ;;  %s1065_s24 = sld [smem:[#allocation2 + $0x39]] }
  0x32   :  { %v194_v37 = vstv %s1025_s15  ;;  %v208_v38 = vstv %s1028_s16  ;;  %v177_v39 = vmul.f32 %v717_v21, %v176_v28  ;;  %v178_v40 = vmul.f32 %v718_v22, %v176_v28  ;;  %s1068_s25 = sld [smem:[#allocation2 + $0x49]] }
  0x33   :  { %vm201_vm8 = vcmp.ge.f32.partialorder %v968_v16, %v200_v29  ;;  %vm202_vm9 = vcmp.ge.f32.partialorder %v972_v18, %v200_v29  ;;  %v183_v41 = vmul.f32 %v717_v21, %v182_v33  ;;  %v184_v42 = vmul.f32 %v718_v22, %v182_v33  ;;  %s1072_s26 = sld [smem:[#allocation2 + $0x59]] }
  0x34   :  { %v189_v43 = vmul.f32 %v717_v21, %v188_v34  ;;  %v725_v44 = vsel %vm201_vm8, 1.0, %v898_v20  ;;  %v159_v45 = vadd.f32 %v157_v25, %v121_v7  ;;  %v160_v46 = vadd.f32 %v158_v27, %v122_v8  ;;  %s1074_s27 = sld [smem:[#allocation2 + $0x1a]] }
  0x35   :  { %v190_v47 = vmul.f32 %v718_v22, %v188_v34  ;;  %v195_v48 = vmul.f32 %v717_v21, %v194_v37  ;;  %v173_v49 = vadd.f32 %v171_v35, %v135_v9  ;;  %v174_v50 = vadd.f32 %v172_v36, %v136_v13  ;;  %s1080_s28 = sld [smem:[#allocation2 + $0x2a]] }
  0x36   :  { %v196_v51 = vmul.f32 %v718_v22, %v194_v37  ;;  %v726_v52 = vsel %vm202_vm9, 1.0, %v898_v20  ;;  %v179_v53 = vadd.f32 %v177_v39, %v141_v14  ;;  %v180_v54 = vadd.f32 %v178_v40, %v142_v15  ;;  %s1084_s29 = sld [smem:[#allocation2 + $0x3a]] }
  0x37   :  { %v209_v55 = vmul.f32 %v725_v44, %v208_v38  ;;  %v214_v56 = vstv %s1034_s17  ;;  %v185_v57 = vadd.f32 %v183_v41, %v147_v17  ;;  %v186_v58 = vadd.f32 %v184_v42, %v148_v19  ;;  %s1087_s30 = sld [smem:[#allocation2 + $0x4a]] }
  0x38   :  { %v191_v59 = vadd.f32 %v189_v43, %v153_v31  ;;  %v220_v60 = vstv %s1039_s18  ;;  %v192_v61 = vadd.f32 %v190_v47, %v154_v32  ;;  %v197_v62 = vadd.f32 %v195_v48, %v159_v45  ;;  %s1090_s3 = sld [smem:[#allocation2 + $0x5a]] }
  0x39   :  { %v210_v63 = vmul.f32 %v726_v52, %v208_v38  ;;  %v226_v3 = vstv %s1043_s0  ;;  %v198_v4 = vadd.f32 %v196_v51, %v160_v46  ;;  %v215_v5 = vmul.f32 %v725_v44, %v214_v56  ;;  %s1093_s4 = sld [smem:[#allocation2 + $0xb]] }
  0x3a   :  { %v232_v6 = vstv %s1047_s1  ;;  %v238_v7 = vstv %s1051_s20  ;;  %v211_v8 = vadd.f32 %v209_v55, %v173_v49  ;;  %v216_v9 = vmul.f32 %v726_v52, %v214_v56  ;;  %s1099_s5 = sld [smem:[#allocation2 + $0x1b]] }
  0x3b   :  { %v221_v10 = vmul.f32 %v725_v44, %v220_v60  ;;  %v222_v11 = vmul.f32 %v726_v52, %v220_v60  ;;  %v227_v12 = vmul.f32 %v725_v44, %v226_v3  ;;  %v228_v13 = vmul.f32 %v726_v52, %v226_v3  ;;  %s1102_s6 = sld [smem:[#allocation2 + $0x2b]] }
  0x3c   :  { %vm239_vm10 = vcmp.ge.f32.partialorder %v968_v16, %v238_v7  ;;  %vm240_vm11 = vcmp.ge.f32.partialorder %v972_v18, %v238_v7  ;;  %v212_v14 = vadd.f32 %v210_v63, %v174_v50  ;;  %v233_v15 = vmul.f32 %v725_v44, %v232_v6  ;;  %s1106_s7 = sld [smem:[#allocation2 + $0x3b]] }
  0x3d   :  { %v733_v17 = vsel %vm239_vm10, 1.0, %v898_v20  ;;  %v246_v19 = vstv %s1056_s21  ;;  %v217_v21 = vadd.f32 %v215_v5, %v179_v53  ;;  %v234_v22 = vmul.f32 %v726_v52, %v232_v6  ;;  %s1109_s8 = sld [smem:[#allocation2 + $0xc]] }
  0x3e   :  { %v734_v23 = vsel %vm240_vm11, 1.0, %v898_v20  ;;  %v252_v25 = vstv %s1059_s22  ;;  %v218_v27 = vadd.f32 %v216_v9, %v180_v54  ;;  %v223_v28 = vadd.f32 %v221_v10, %v185_v57  ;;  %s1112_s9 = sld [smem:[#allocation2 + $0x4b]] }
  0x3f   :  { %v224_v29 = vadd.f32 %v222_v11, %v186_v58  ;;  %v276_v31 = vstv %s1062_s23  ;;  %v229_v32 = vadd.f32 %v227_v12, %v191_v59  ;;  %v230_v33 = vadd.f32 %v228_v13, %v192_v61  ;;  %s1115_s10 = sld [smem:[#allocation2 + $0x5b]] }
  0x40   :  { %v247_v34 = vmul.f32 %v733_v17, %v246_v19  ;;  %v258_v35 = vstv %s1065_s24  ;;  %v235_v36 = vadd.f32 %v233_v15, %v197_v62  ;;  %v248_v37 = vmul.f32 %v734_v23, %v246_v19  ;;  %s1118_s11 = sld [smem:[#allocation2 + $0x1c]] }
  0x41   :  { %v253_v38 = vmul.f32 %v733_v17, %v252_v25  ;;  %v264_v39 = vstv %s1068_s25  ;;  %v236_v40 = vadd.f32 %v234_v22, %v198_v4  ;;  %v254_v41 = vmul.f32 %v734_v23, %v252_v25  ;;  %s1122_s12 = sld [smem:[#allocation2 + $0x2c]] }
  0x42   :  { %vm277_vm12 = vcmp.ge.f32.partialorder %v968_v16, %v276_v31  ;;  %vm278_vm13 = vcmp.ge.f32.partialorder %v972_v18, %v276_v31  ;;  %v259_v42 = vmul.f32 %v733_v17, %v258_v35  ;;  %v260_v43 = vmul.f32 %v734_v23, %v258_v35  ;;  %s1124_s13 = sld [smem:[#allocation2 + $0x3c]] }
  0x43   :  { %v270_v44 = vstv %s1072_s26  ;;  %v284_v45 = vstv %s1074_s27  ;;  %v249_v46 = vadd.f32 %v247_v34, %v211_v8  ;;  %v265_v47 = vmul.f32 %v733_v17, %v264_v39  ;;  %s1131_s14 = sld [smem:[#allocation2 + $0x4c]] }
  0x44   :  { %v266_v48 = vmul.f32 %v734_v23, %v264_v39  ;;  %v741_v49 = vsel %vm277_vm12, 1.0, %v898_v20  ;;  %v250_v50 = vadd.f32 %v248_v37, %v212_v14  ;;  %v255_v51 = vadd.f32 %v253_v38, %v217_v21  ;;  %s1134_s15 = sld [smem:[#allocation2 + $0x5c]] }
  0x45   :  { %v742_v52 = vsel %vm278_vm13, 1.0, %v898_v20  ;;  %v290_v53 = vstv %s1080_s28  ;;  %v256_v54 = vadd.f32 %v254_v41, %v218_v27  ;;  %v271_v55 = vmul.f32 %v733_v17, %v270_v44  ;;  %s1138_s16 = sld [smem:[#allocation2 + $0xd]] }
  0x46   :  { %v272_v56 = vmul.f32 %v734_v23, %v270_v44  ;;  %v296_v57 = vstv %s1084_s29  ;;  %v261_v58 = vadd.f32 %v259_v42, %v223_v28  ;;  %v262_v59 = vadd.f32 %v260_v43, %v224_v29  ;;  %s1143_s17 = sld [smem:[#allocation2 + $0x1d]] }
  0x47   :  { %v285_v60 = vmul.f32 %v741_v49, %v284_v45  ;;  %v302_v61 = vstv %s1087_s30  ;;  %v286_v62 = vmul.f32 %v742_v52, %v284_v45  ;;  %v291_v63 = vmul.f32 %v741_v49, %v290_v53  ;;  %s1146_s18 = sld [smem:[#allocation2 + $0x2d]] }
  0x48   :  { %v292_v3 = vmul.f32 %v742_v52, %v290_v53  ;;  %v308_v4 = vstv %s1090_s3  ;;  %v267_v5 = vadd.f32 %v265_v47, %v229_v32  ;;  %v268_v6 = vadd.f32 %v266_v48, %v230_v33  ;;  %s1149_s0 = sld [smem:[#allocation2 + $0x3d]] }
  0x49   :  { %v297_v7 = vmul.f32 %v741_v49, %v296_v57  ;;  %v314_v8 = vstv %s1093_s4  ;;  %v273_v9 = vadd.f32 %v271_v55, %v235_v36  ;;  %v274_v10 = vadd.f32 %v272_v56, %v236_v40  ;;  %s1153_s1 = sld [smem:[#allocation2 + $0x4d]] }
  0x4a   :  { %v298_v11 = vmul.f32 %v742_v52, %v296_v57  ;;  %v303_v12 = vmul.f32 %v741_v49, %v302_v61  ;;  %v304_v13 = vmul.f32 %v742_v52, %v302_v61  ;;  %v309_v14 = vmul.f32 %v741_v49, %v308_v4  ;;  %s1155_s20 = sld [smem:[#allocation2 + $0xe]] }
  0x4b   :  { %vm315_vm14 = vcmp.ge.f32.partialorder %v968_v16, %v314_v8  ;;  %vm316_vm15 = vcmp.ge.f32.partialorder %v972_v18, %v314_v8  ;;  %v287_v15 = vadd.f32 %v285_v60, %v249_v46  ;;  %v288_v17 = vadd.f32 %v286_v62, %v250_v50  ;;  %s1157_s21 = sld [smem:[#allocation2 + $0x5d]] }
  0x4c   :  { %v293_v19 = vadd.f32 %v291_v63, %v255_v51  ;;  %v294_v21 = vadd.f32 %v292_v3, %v256_v54  ;;  %v299_v22 = vadd.f32 %v297_v7, %v261_v58  ;;  %v749_v23 = vsel %vm315_vm14, 1.0, %v898_v20  ;;  %s1160_s22 = sld [smem:[#allocation2 + $0x1e]] }
  0x4d   :  { %v750_v25 = vsel %vm316_vm15, 1.0, %v898_v20  ;;  %v322_v27 = vstv %s1099_s5  ;;  %v300_v28 = vadd.f32 %v298_v11, %v262_v59  ;;  %v310_v29 = vmul.f32 %v742_v52, %v308_v4  ;;  %s1166_s23 = sld [smem:[#allocation2 + $0x2e]] }
  0x4e   :  { %v328_v31 = vstv %s1102_s6  ;;  %v352_v32 = vstv %s1109_s8  ;;  %v305_v33 = vadd.f32 %v303_v12, %v267_v5  ;;  %v306_v34 = vadd.f32 %v304_v13, %v268_v6  ;;  %s1171_s24 = sld [smem:[#allocation2 + $0x3e]] }
  0x4f   :  { %v311_v35 = vadd.f32 %v309_v14, %v273_v9  ;;  %v334_v36 = vstv %s1106_s7  ;;  %v323_v37 = vmul.f32 %v749_v23, %v322_v27  ;;  %v324_v38 = vmul.f32 %v750_v25, %v322_v27  ;;  %s1177_s25 = sld [smem:[#allocation2 + $0x4e]] }
  0x50   :  { %v340_v39 = vstv %s1112_s9  ;;  %v346_v40 = vstv %s1115_s10  ;;  %v329_v41 = vmul.f32 %v749_v23, %v328_v31  ;;  %vm353_vm2 = vcmp.ge.f32.partialorder %v968_v16, %v352_v32  ;;  %s1181_s26 = sld [smem:[#allocation2 + $0xf]] }
  0x51   :  { %vm354_vm3 = vcmp.ge.f32.partialorder %v972_v18, %v352_v32  ;;  %v360_v42 = vstv %s1118_s11  ;;  %v330_v43 = vmul.f32 %v750_v25, %v328_v31  ;;  %v335_v44 = vmul.f32 %v749_v23, %v334_v36  ;;  %s1185_s27 = sld [smem:[#allocation2 + $0x5e]] }
  0x52   :  { %v336_v45 = vmul.f32 %v750_v25, %v334_v36  ;;  %v757_v46 = vsel %vm353_vm2, 1.0, %v898_v20  ;;  %v312_v47 = vadd.f32 %v310_v29, %v274_v10  ;;  %v341_v48 = vmul.f32 %v749_v23, %v340_v39  ;;  %s1189_s28 = sld [smem:[#allocation2 + $0x1f]] }
  0x53   :  { %v342_v49 = vmul.f32 %v750_v25, %v340_v39  ;;  %v758_v50 = vsel %vm354_vm3, 1.0, %v898_v20  ;;  %v325_v51 = vadd.f32 %v323_v37, %v287_v15  ;;  %v326_v52 = vadd.f32 %v324_v38, %v288_v17  ;;  %s1191_s29 = sld [smem:[#allocation2 + $0x2f]] }
  0x54   :  { %v366_v53 = vstv %s1122_s12  ;;  %v372_v54 = vstv %s1124_s13  ;;  %v331_v55 = vadd.f32 %v329_v41, %v293_v19  ;;  %v347_v56 = vmul.f32 %v749_v23, %v346_v40  ;;  %s1194_s30 = sld [smem:[#allocation2 + $0x3f]] }
  0x55   :  { %v348_v57 = vmul.f32 %v750_v25, %v346_v40  ;;  %v361_v58 = vmul.f32 %v757_v46, %v360_v42  ;;  %v332_v59 = vadd.f32 %v330_v43, %v294_v21  ;;  %v337_v60 = vadd.f32 %v335_v44, %v299_v22  ;;  %s1197_s3 = sld [smem:[#allocation2 + $0x10]] }
  0x56   :  { %v338_v61 = vadd.f32 %v336_v45, %v300_v28  ;;  %v362_v62 = vmul.f32 %v758_v50, %v360_v42  ;;  %v367_v63 = vmul.f32 %v757_v46, %v366_v53  ;;  %v368_v3 = vmul.f32 %v758_v50, %v366_v53  ;;  %s1199_s4 = sld [smem:[#allocation2 + $0x4f]] }
  0x57   :  { %v373_v4 = vmul.f32 %v757_v46, %v372_v54  ;;  %v378_v5 = vstv %s1131_s14  ;;  %v343_v6 = vadd.f32 %v341_v48, %v305_v33  ;;  %v344_v7 = vadd.f32 %v342_v49, %v306_v34  ;;  %s1202_s5 = sld [smem:[#allocation2 + $0x5f]] }
  0x58   :  { %v374_v8 = vmul.f32 %v758_v50, %v372_v54  ;;  %v390_v9 = vstv %s1138_s16  ;;  %v349_v10 = vadd.f32 %v347_v56, %v311_v35  ;;  %v350_v11 = vadd.f32 %v348_v57, %v312_v47  ;;  %s1205_s6 = sld [smem:[#allocation2 + $0x20]] }
  0x59   :  { %v363_v12 = vadd.f32 %v361_v58, %v325_v51  ;;  %v384_v13 = vstv %s1134_s15  ;;  %v379_v14 = vmul.f32 %v757_v46, %v378_v5  ;;  %v380_v15 = vmul.f32 %v758_v50, %v378_v5  ;;  %s1212_s7 = sld [smem:[#allocation2 + $0x30]] }
  0x5a   :  { %vm391_vm4 = vcmp.ge.f32.partialorder %v968_v16, %v390_v9  ;;  %vm392_vm5 = vcmp.ge.f32.partialorder %v972_v18, %v390_v9  ;;  %v364_v17 = vadd.f32 %v362_v62, %v326_v52  ;;  %v369_v19 = vadd.f32 %v367_v63, %v331_v55  ;;  %s1216_s8 = sld [smem:[#allocation2 + $0x40]] }
  0x5b   :  { %v370_v21 = vadd.f32 %v368_v3, %v332_v59  ;;  %v375_v22 = vadd.f32 %v373_v4, %v337_v60  ;;  %v376_v23 = vadd.f32 %v374_v8, %v338_v61  ;;  %v765_v25 = vsel %vm391_vm4, 1.0, %v898_v20  ;;  %s1219_s9 = sld [smem:[#allocation2 + $0x50]] }
  0x5c   :  { %v766_v27 = vsel %vm392_vm5, 1.0, %v898_v20  ;;  %v398_v28 = vstv %s1143_s17  ;;  %v385_v29 = vmul.f32 %v757_v46, %v384_v13  ;;  %v386_v31 = vmul.f32 %v758_v50, %v384_v13  ;;  %s1223_s10 = sld [smem:[#allocation2 + $0x60]] }
  0x5d   :  { %v404_v32 = vstv %s1146_s18  ;;  %v428_v33 = vstv %s1155_s20  ;;  %v381_v34 = vadd.f32 %v379_v14, %v343_v6  ;;  %v382_v35 = vadd.f32 %v380_v15, %v344_v7  ;;  %s1226_s11 = sld [smem:[#allocation2 + $0x11]] }
  0x5e   :  { %v410_v36 = vstv %s1149_s0  ;;  %v416_v37 = vstv %s1153_s1  ;;  %v399_v38 = vmul.f32 %v765_v25, %v398_v28  ;;  %v400_v39 = vmul.f32 %v766_v27, %v398_v28  ;;  %s1232_s12 = sld [smem:[#allocation2 + $0x21]] }
  0x5f   :  { %v422_v40 = vstv %s1157_s21  ;;  %v436_v41 = vstv %s1160_s22  ;;  %v405_v42 = vmul.f32 %v765_v25, %v404_v32  ;;  %v406_v43 = vmul.f32 %v766_v27, %v404_v32  ;;  %s1234_s13 = sld [smem:[#allocation2 + $0x31]] }
  0x60   :  { %vm429_vm6 = vcmp.ge.f32.partialorder %v968_v16, %v428_v33  ;;  %vm430_vm7 = vcmp.ge.f32.partialorder %v972_v18, %v428_v33  ;;  %v411_v44 = vmul.f32 %v765_v25, %v410_v36  ;;  %v412_v45 = vmul.f32 %v766_v27, %v410_v36  ;;  %s1238_s14 = sld [smem:[#allocation2 + $0x41]] }
  0x61   :  { %v773_v46 = vsel %vm429_vm6, 1.0, %v898_v20  ;;  %v774_v47 = vsel %vm430_vm7, 1.0, %v898_v20  ;;  %v387_v48 = vadd.f32 %v385_v29, %v349_v10  ;;  %v388_v49 = vadd.f32 %v386_v31, %v350_v11  ;;  %s1241_s15 = sld [smem:[#allocation2 + $0x12]] }
  0x62   :  { %v417_v50 = vmul.f32 %v765_v25, %v416_v37  ;;  %v418_v51 = vmul.f32 %v766_v27, %v416_v37  ;;  %v401_v52 = vadd.f32 %v399_v38, %v363_v12  ;;  %v402_v53 = vadd.f32 %v400_v39, %v364_v17  ;;  %s1243_s16 = sld [smem:[#allocation2 + $0x51]] }
  0x63   :  { %v423_v54 = vmul.f32 %v765_v25, %v422_v40  ;;  %v442_v55 = vstv %s1166_s23  ;;  %v424_v56 = vmul.f32 %v766_v27, %v422_v40  ;;  %v437_v57 = vmul.f32 %v773_v46, %v436_v41  ;;  %s1246_s17 = sld [smem:[#allocation2 + $0x61]] }
  0x64   :  { %v438_v58 = vmul.f32 %v774_v47, %v436_v41  ;;  %v448_v59 = vstv %s1171_s24  ;;  %v407_v60 = vadd.f32 %v405_v42, %v369_v19  ;;  %v408_v61 = vadd.f32 %v406_v43, %v370_v21  ;;  %s1250_s18 = sld [smem:[#allocation2 + $0x22]] }
  0x65   :  { %v413_v62 = vadd.f32 %v411_v44, %v375_v22  ;;  %v414_v63 = vadd.f32 %v412_v45, %v376_v23  ;;  %v419_v3 = vadd.f32 %v417_v50, %v381_v34  ;;  %v420_v4 = vadd.f32 %v418_v51, %v382_v35  ;;  %s1256_s0 = sld [smem:[#allocation2 + $0x42]] }
  0x66   :  { %v443_v5 = vmul.f32 %v773_v46, %v442_v55  ;;  %v454_v6 = vstv %s1177_s25  ;;  %v425_v7 = vadd.f32 %v423_v54, %v387_v48  ;;  %v444_v8 = vmul.f32 %v774_v47, %v442_v55  ;;  %s1261_s1 = sld [smem:[#allocation2 + $0x52]] }
  0x67   :  { %v449_v9 = vmul.f32 %v773_v46, %v448_v59  ;;  %v466_v10 = vstv %s1181_s26  ;;  %v426_v11 = vadd.f32 %v424_v56, %v388_v49  ;;  %v439_v12 = vadd.f32 %v437_v57, %v401_v52  ;;  %s1266_s20 = sld [smem:[#allocation2 + $0x62]] }
  0x68   :  { %v440_v13 = vadd.f32 %v438_v58, %v402_v53  ;;  %v450_v14 = vmul.f32 %v774_v47, %v448_v59  ;;  %v455_v15 = vmul.f32 %v773_v46, %v454_v6  ;;  %v460_v17 = vstv %s1185_s27  ;;  %s1269_s21 = sld [smem:[#allocation2 + $0x32]] }
  0x69   :  { %vm467_vm8 = vcmp.ge.f32.partialorder %v968_v16, %v466_v10  ;;  %vm468_vm9 = vcmp.ge.f32.partialorder %v972_v18, %v466_v10  ;;  %v445_v19 = vadd.f32 %v443_v5, %v407_v60  ;;  %v456_v21 = vmul.f32 %v774_v47, %v454_v6  ;;  %s1272_s22 = sld [smem:[#allocation2 + $0x13]] }
  0x6a   :  { %v781_v22 = vsel %vm467_vm8, 1.0, %v898_v20  ;;  %v474_v23 = vstv %s1189_s28  ;;  %v446_v25 = vadd.f32 %v444_v8, %v408_v61  ;;  %v451_v27 = vadd.f32 %v449_v9, %v413_v62  ;;  %s1276_s23 = sld [smem:[#allocation2 + $0x23]] }
  0x6b   :  { %v782_v28 = vsel %vm468_vm9, 1.0, %v898_v20  ;;  %v480_v29 = vstv %s1191_s29  ;;  %v452_v31 = vadd.f32 %v450_v14, %v414_v63  ;;  %v461_v32 = vmul.f32 %v773_v46, %v460_v17  ;;  %s1281_s24 = sld [smem:[#allocation2 + $0x53]]  ;;  %s678_s29 = sshll.u32 %s899_s19, 4  ;;  %s679_s29 = int_to_ptr.vmem [resolvable:$true] %s678_s29 }
  0x6c   :  { %v462_v33 = vmul.f32 %v774_v47, %v460_v17  ;;  %v504_v34 = vstv %s1197_s3  ;;  %v457_v35 = vadd.f32 %v455_v15, %v419_v3  ;;  %v475_v36 = vmul.f32 %v781_v22, %v474_v23  ;;  %s1283_s25 = sld [smem:[#allocation2 + $0x43]] }
  0x6d   :  { %v486_v37 = vstv %s1194_s30  ;;  %v492_v38 = vstv %s1199_s4  ;;  %v458_v39 = vadd.f32 %v456_v21, %v420_v4  ;;  %v476_v40 = vmul.f32 %v782_v28, %v474_v23  ;;  %s1289_s26 = sld [smem:[#allocation2 + $0x63]]  ;;  %s680_s4 = sshll.u32 %s1329_s2, 4  ;;  %s681_s4 = int_to_ptr.hbm [resolvable:$true] %s680_s4 }
  0x6e   :  { %v481_v41 = vmul.f32 %v781_v22, %v480_v29  ;;  %v498_v42 = vstv %s1202_s5  ;;  %v482_v43 = vmul.f32 %v782_v28, %v480_v29  ;;  %vm505_vm10 = vcmp.ge.f32.partialorder %v968_v16, %v504_v34  ;;  %s1295_s27 = sld [smem:[#allocation2 + $0x33]] }
  0x6f   :  { %vm506_vm11 = vcmp.ge.f32.partialorder %v972_v18, %v504_v34  ;;  %v512_v44 = vstv %s1205_s6  ;;  %v487_v45 = vmul.f32 %v781_v22, %v486_v37  ;;  %v488_v46 = vmul.f32 %v782_v28, %v486_v37  ;;  %s1307_s28 = sld [smem:[#allocation2 + $0x1]] }
  0x70   :  { %v493_v47 = vmul.f32 %v781_v22, %v492_v38  ;;  %v789_v48 = vsel %vm505_vm10, 1.0, %v898_v20  ;;  %v463_v49 = vadd.f32 %v461_v32, %v425_v7  ;;  %v464_v50 = vadd.f32 %v462_v33, %v426_v11 }
  0x71   :  { %v477_v51 = vadd.f32 %v475_v36, %v439_v12  ;;  %v494_v52 = vmul.f32 %v782_v28, %v492_v38  ;;  %v478_v53 = vadd.f32 %v476_v40, %v440_v13  ;;  %v483_v54 = vadd.f32 %v481_v41, %v445_v19 }
  0x72   :  { %v790_v55 = vsel %vm506_vm11, 1.0, %v898_v20  ;;  %v518_v56 = vstv %s1212_s7  ;;  %v499_v57 = vmul.f32 %v781_v22, %v498_v42  ;;  %v500_v58 = vmul.f32 %v782_v28, %v498_v42 }
  0x73   :  { %v513_v59 = vmul.f32 %v789_v48, %v512_v44  ;;  %v524_v60 = vstv %s1216_s8  ;;  %v484_v61 = vadd.f32 %v482_v43, %v446_v25  ;;  %v489_v62 = vadd.f32 %v487_v45, %v451_v27 }
  0x74   :  { %v490_v63 = vadd.f32 %v488_v46, %v452_v31  ;;  %v495_v3 = vadd.f32 %v493_v47, %v457_v35  ;;  %v514_v4 = vmul.f32 %v790_v55, %v512_v44  ;;  %v519_v5 = vmul.f32 %v789_v48, %v518_v56 }
  0x75   :  { %v520_v6 = vmul.f32 %v790_v55, %v518_v56  ;;  %v530_v7 = vstv %s1219_s9  ;;  %v496_v8 = vadd.f32 %v494_v52, %v458_v39  ;;  %v525_v9 = vmul.f32 %v789_v48, %v524_v60 }
  0x76   :  { %v536_v10 = vstv %s1223_s10  ;;  %v542_v11 = vstv %s1226_s11  ;;  %v501_v12 = vadd.f32 %v499_v57, %v463_v49  ;;  %v502_v13 = vadd.f32 %v500_v58, %v464_v50 }
  0x77   :  { %v515_v14 = vadd.f32 %v513_v59, %v477_v51  ;;  %v526_v15 = vmul.f32 %v790_v55, %v524_v60  ;;  %v531_v17 = vmul.f32 %v789_v48, %v530_v7  ;;  %v532_v19 = vmul.f32 %v790_v55, %v530_v7 }
  0x78   :  { %vm543_vm12 = vcmp.ge.f32.partialorder %v968_v16, %v542_v11  ;;  %vm544_vm13 = vcmp.ge.f32.partialorder %v972_v18, %v542_v11  ;;  %v516_v21 = vadd.f32 %v514_v4, %v478_v53  ;;  %v521_v22 = vadd.f32 %v519_v5, %v483_v54 }
  0x79   :  { %v1254_v23 = vadd.f32 %v520_v6, %v484_v61  ;;  %v537_v25 = vmul.f32 %v789_v48, %v536_v10  ;;  %v527_v27 = vadd.f32 %v525_v9, %v489_v62  ;;  %v797_v28 = vsel %vm543_vm12, 1.0, %v898_v20 }
  0x7a   :  { %v798_v29 = vsel %vm544_vm13, 1.0, %v898_v20  ;;  %v550_v31 = vstv %s1232_s12  ;;  %v538_v32 = vmul.f32 %v790_v55, %v536_v10  ;;  %v556_v33 = vstv %s1234_s13 }
  0x7b   :  { %v562_v34 = vstv %s1238_s14  ;;  %v580_v35 = vstv %s1241_s15  ;;  %v528_v36 = vadd.f32 %v526_v15, %v490_v63  ;;  %v533_v37 = vadd.f32 %v531_v17, %v495_v3 }
  0x7c   :  { %v534_v38 = vadd.f32 %v532_v19, %v496_v8  ;;  %v568_v39 = vstv %s1243_s16  ;;  %v539_v40 = vadd.f32 %v537_v25, %v501_v12  ;;  %v551_v41 = vmul.f32 %v797_v28, %v550_v31 }
  0x7d   :  { %v552_v42 = vmul.f32 %v798_v29, %v550_v31  ;;  %v574_v43 = vstv %s1246_s17  ;;  %v557_v44 = vmul.f32 %v797_v28, %v556_v33  ;;  %v563_v45 = vmul.f32 %v797_v28, %v562_v34 }
  0x7e   :  { %vm581_vm14 = vcmp.ge.f32.partialorder %v968_v16, %v580_v35  ;;  %vm582_vm15 = vcmp.ge.f32.partialorder %v972_v18, %v580_v35  ;;  %v540_v46 = vadd.f32 %v538_v32, %v502_v13  ;;  %v564_v47 = vmul.f32 %v798_v29, %v562_v34 }
  0x7f   :  { %v569_v48 = vmul.f32 %v797_v28, %v568_v39  ;;  %v588_v49 = vstv %s1250_s18  ;;  %v570_v50 = vmul.f32 %v798_v29, %v568_v39  ;;  %v575_v51 = vmul.f32 %v797_v28, %v574_v43 }
  0x80   :  { %v805_v52 = vsel %vm581_vm14, 1.0, %v898_v20  ;;  %v806_v53 = vsel %vm582_vm15, 1.0, %v898_v20  ;;  %v553_v54 = vadd.f32 %v551_v41, %v515_v14  ;;  %v554_v55 = vadd.f32 %v552_v42, %v516_v21 }
  0x81   :  { %v558_v56 = vmul.f32 %v798_v29, %v556_v33  ;;  %v576_v57 = vmul.f32 %v798_v29, %v574_v43  ;;  %v1285_v58 = vadd.f32 %v557_v44, %v521_v22  ;;  %v565_v59 = vadd.f32 %v563_v45, %v527_v27 }
  0x82   :  { %v600_v60 = vstv %s1256_s0  ;;  %v606_v61 = vstv %s1261_s1  ;;  %v566_v62 = vadd.f32 %v564_v47, %v528_v36  ;;  %v589_v63 = vmul.f32 %v805_v52, %v588_v49 }
  0x83   :  { %v590_v3 = vmul.f32 %v806_v53, %v588_v49  ;;  %v612_v4 = vstv %s1266_s20  ;;  %v571_v5 = vadd.f32 %v569_v48, %v533_v37  ;;  %v572_v6 = vadd.f32 %v570_v50, %v534_v38 }
  0x84   :  { %v577_v7 = vadd.f32 %v575_v51, %v539_v40  ;;  %v594_v8 = vstv %s1269_s21  ;;  %v578_v9 = vadd.f32 %v576_v57, %v540_v46  ;;  %v601_v10 = vmul.f32 %v805_v52, %v600_v60 }
  0x85   :  { %v607_v11 = vmul.f32 %v805_v52, %v606_v61  ;;  %v618_v12 = vstv %s1272_s22  ;;  %v608_v13 = vmul.f32 %v806_v53, %v606_v61  ;;  %v613_v14 = vmul.f32 %v805_v52, %v612_v4 }
  0x86   :  { %v614_v15 = vmul.f32 %v806_v53, %v612_v4  ;;  %v626_v17 = vstv %s1276_s23  ;;  %v591_v19 = vadd.f32 %v589_v63, %v553_v54  ;;  %v592_v21 = vadd.f32 %v590_v3, %v554_v55 }
  0x87   :  { %vm619_vm2 = vcmp.ge.f32.partialorder %v968_v16, %v618_v12  ;;  %vm620_vm3 = vcmp.ge.f32.partialorder %v972_v18, %v618_v12  ;;  %v602_v22 = vmul.f32 %v806_v53, %v600_v60  ;;  %v644_v28 = vstv %s1281_s24 }
  0x88   :  { %v813_v25 = vsel %vm619_vm2, 1.0, %v898_v20  ;;  %v814_v27 = vsel %vm620_vm3, 1.0, %v898_v20  ;;  %v609_v29 = vadd.f32 %v607_v11, %v571_v5  ;;  %v638_v33 = vstv %s1283_s25 }
  0x89   :  { %v627_v31 = vmul.f32 %v813_v25, %v626_v17  ;;  %v628_v32 = vmul.f32 %v814_v27, %v626_v17  ;;  %v610_v34 = vadd.f32 %v608_v13, %v572_v6  ;;  %v615_v35 = vadd.f32 %v613_v14, %v577_v7  ;;  %v828_v6 = vld [vmem:[#allocation6] sm:$0xff] }
  0x8a   :  { %v616_v36 = vadd.f32 %v614_v15, %v578_v9  ;;  %v650_v37 = vstv %s1289_s26  ;;  %v645_v40 = vmul.f32 %v813_v25, %v644_v28  ;;  %v646_v41 = vmul.f32 %v814_v27, %v644_v28 }
  0x8b   :  { %v629_v38 = vadd.f32 %v627_v31, %v591_v19  ;;  %v630_v39 = vadd.f32 %v628_v32, %v592_v21  ;;  %v560_v42 = vadd.f32 %v558_v56, %v1254_v23  ;;  %v595_v43 = vmul.f32 %v805_v52, %v594_v8 }
  0x8c   :  { %v596_v44 = vmul.f32 %v806_v53, %v594_v8  ;;  %v603_v20 = vadd.f32 %v601_v10, %v565_v59  ;;  %v651_v45 = vmul.f32 %v813_v25, %v650_v37  ;;  %v652_v46 = vmul.f32 %v814_v27, %v650_v37  ;;  %v829_v8 = vld [vmem:[#allocation6 + $0x8] sm:$0xff] }
  0x8d   :  { %v655_v47 = vsub.f32 %v968_v16, %v629_v38  ;;  %v656_v48 = vsub.f32 %v972_v18, %v630_v39  ;;  %v604_v49 = vadd.f32 %v602_v22, %v566_v62  ;;  %v632_v50 = vstv %s1295_s27 }
  0x8e   :  { %v639_v51 = vmul.f32 %v813_v25, %v638_v33  ;;  %v640_v54 = vmul.f32 %v814_v27, %v638_v33  ;;  %v647_v55 = vadd.f32 %v645_v40, %v609_v29  ;;  %v648_v57 = vadd.f32 %v646_v41, %v610_v34 }
  0x8f   :  { %v653_v23 = vadd.f32 %v651_v45, %v615_v35  ;;  %v654_v52 = vadd.f32 %v652_v46, %v616_v36  ;;  %v57_v53 = vadd.f32 %v56_v24, %v988_v26  ;;  %v58_v56 = vadd.f32 %v56_v24, %v996_v30 }
  0x90   :  { %v597_v18 = vadd.f32 %v595_v43, %v1285_v58  ;;  %v598_v60 = vadd.f32 %v596_v44, %v560_v42  ;;  %v633_v61 = vmul.f32 %v813_v25, %v632_v50  ;;  %v634_v62 = vmul.f32 %v814_v27, %v632_v50 }
  0x91   :  { %v657_v59 = vmul.f32 %v655_v47, %v653_v23  ;;  %v658_v16 = vmul.f32 %v656_v48, %v654_v52  ;;  %v641_v63 = vadd.f32 %v639_v51, %v603_v20  ;;  %v642_v3 = vadd.f32 %v640_v54, %v604_v49 }
  0x92   :  { %v59_v7 = vmul.f32 %v828_v6, %v57_v53  ;;  %v60_v9 = vmul.f32 %v829_v8, %v58_v56  ;;  %v62_v11 = vstv %s1307_s28  ;;  %v635_v24 = vadd.f32 %v633_v61, %v597_v18 }
  0x93   :  { %v659_v4 = vadd.f32 %v657_v59, %v647_v55  ;;  %v660_v5 = vadd.f32 %v658_v16, %v648_v57  ;;  %v636_v30 = vadd.f32 %v634_v62, %v598_v60 }
  0x94   :  { %v63_v14 = vadd.f32 %v62_v11, %v59_v7  ;;  %v64_v58 = vadd.f32 %v62_v11, %v60_v9 }
  0x95   :  { %v661_v26 = vmul.f32 %v659_v4, %v655_v47  ;;  %v662_v10 = vmul.f32 %v660_v5, %v656_v48 }
  0x97   :  { %v663_v12 = vadd.f32 %v661_v26, %v641_v63  ;;  %v664_v13 = vadd.f32 %v662_v10, %v642_v3 }
  0x99   :  { %v665_v15 = vmul.f32 %v663_v12, %v655_v47  ;;  %v666_v17 = vmul.f32 %v664_v13, %v656_v48 }
  0x9b   :  { %v667_v19 = vadd.f32 %v665_v15, %v635_v24  ;;  %v668_v21 = vadd.f32 %v666_v17, %v636_v30 }
  0x9d   :  { %v669_v22 = vsel %vm43_vm0, %v63_v14, %v667_v19  ;;  %v670_v25 = vsel %vm44_vm1, %v64_v58, %v668_v21 }
  0x9e   :  { %671 = vst [vmem:[#allocation7] sm:$0xff] %v669_v22 }
  0x9f   :  { %672 = vst [vmem:[#allocation7 + $0x8] sm:$0xff] %v670_v25 }
  0xa0   :  { %683 = dma.vmem_to_hbm [thread:$0]  %s679_s29, 256, %s681_s4, [#allocation4]  }
  0xa1   :  { %894 = dma.done.wait [#allocation4], 256  }
  0xa2   :  { %895 = vsyncadd [#allocation4], 4294967040 }
  0xa3   :  { %688 = vsyncpa [#allocation3], 1 }
  0xa4   :  { %689 = vsyncpa [#allocation4], 1 }
  0xa5   :  { %690 = vsyncpa [#allocation5], 1 }

</bundles_post_ra>
